<compile_context>
chip_gen: v7x
topology: tpu7x:2x2x1
jax: 0.10.0
libtpu: 0.0.40
codegen_flags: <defaults>
</compile_context>

<pallas_src>
import jax
import jax.numpy as jnp
from jax.experimental import pallas as pl
from jax.experimental.pallas import tpu as pltpu

DIM_IN = 300
H1, H2, H3 = 256, 256, 128
DIM_OUT = 64


def _round_up(x, m):
    return ((x + m - 1) // m) * m


def _prelu(x, alpha):
    # PyTorch nn.PReLU() with a single scalar parameter (init 0.25), in f32.
    return jnp.where(x > 0, x, alpha * x)


def _make_kernel(n_towers):
    """Fused 4-layer MLP over `n_towers` input tiles sharing resident weights."""

    def kernel(alphas_ref, *refs):
        x_refs = refs[:n_towers]
        (w1_ref, b1_ref, w2_ref, b2_ref,
         w3_ref, b3_ref, w4_ref, b4_ref) = refs[n_towers:n_towers + 8]
        o_refs = refs[n_towers + 8:]

        a0 = alphas_ref[0]
        a1 = alphas_ref[1]
        a2 = alphas_ref[2]

        for x_ref, o_ref in zip(x_refs, o_refs):
            # Raw f32 x tile -> bf16 in-kernel; MXU matmuls with f32 accum.
            h = jnp.dot(x_ref[...].astype(jnp.bfloat16), w1_ref[...],
                        preferred_element_type=jnp.float32)
            h = _prelu(h + b1_ref[...], a0).astype(jnp.bfloat16)

            h = jnp.dot(h, w2_ref[...], preferred_element_type=jnp.float32)
            h = _prelu(h + b2_ref[...], a1).astype(jnp.bfloat16)

            h = jnp.dot(h, w3_ref[...], preferred_element_type=jnp.float32)
            h = _prelu(h + b3_ref[...], a2).astype(jnp.bfloat16)

            h = jnp.dot(h, w4_ref[...], preferred_element_type=jnp.float32)
            o_ref[...] = (h + b4_ref[...]).astype(o_ref.dtype)

    return kernel


def _embed_towers(xs, kparams, *, block_m=512, out_dtype=jnp.float32):
    """Run the shared embedding net over len(xs) towers in ONE pallas_call.

    xs: tuple of (B, 300) float32 arrays (all same B).
    kparams: output of prepare_params() (bf16 weights, f32 biases/alphas).
    Returns a tuple of (B, 64) arrays.
    """
    n = len(xs)
    B = xs[0].shape[0]
    for x in xs:
        assert x.shape == (B, DIM_IN), x.shape
    (w1, b1), (w2, b2), (w3, b3), (w4, b4), alphas = kparams

    # Batch tile: multiple of 16, capped at block_m, and clamped so the grid
    # keeps >= 4 steps whenever B allows (pipelining + v7x megacore sharding).
    bm = max(16, min(block_m, _round_up(pl.cdiv(B, 4), 16)))
    steps = pl.cdiv(B, bm)   # partial boundary block handled by Pallas masking

    full = lambda a: pl.BlockSpec(a.shape, lambda i: (0,) * a.ndim)
    x_spec = pl.BlockSpec((bm, DIM_IN), lambda i: (i, 0))     # raw f32 rows
    o_spec = pl.BlockSpec((bm, DIM_OUT), lambda i: (i, 0))

    grid_spec = pltpu.PrefetchScalarGridSpec(
        num_scalar_prefetch=0,
        grid=(steps,),
        in_specs=([pl.BlockSpec(memory_space=pltpu.MemorySpace.SMEM)]  # alphas
                  + [x_spec] * n
                  + [full(w1), full(b1), full(w2), full(b2),
                     full(w3), full(b3), full(w4), full(b4)]),
        out_specs=tuple([o_spec] * n),
    )

    layer_macs = DIM_IN * H1 + H1 * H2 + H2 * H3 + H3 * DIM_OUT
    weight_bytes = 2 * layer_macs + 4 * (H1 + H2 + H3 + DIM_OUT) + 4 * 3
    out_itemsize = jnp.dtype(out_dtype).itemsize
    flops = 2 * n * steps * bm * layer_macs
    bytes_accessed = (n * steps * bm * (4 * DIM_IN + out_itemsize * DIM_OUT)
                      + weight_bytes)

    outs = pl.pallas_call(
        _make_kernel(n),
        out_shape=tuple(jax.ShapeDtypeStruct((B, DIM_OUT), out_dtype)
                        for _ in range(n)),
        grid_spec=grid_spec,
        compiler_params=pltpu.CompilerParams(
            dimension_semantics=("parallel",),
            vmem_limit_bytes=32 * 1024 * 1024,   # v7x-safe; footprint ~6 MiB
        ),
        cost_estimate=pl.CostEstimate(
            flops=flops, transcendentals=0, bytes_accessed=bytes_accessed),
    )(alphas, *xs, w1, b1, w2, b2, w3, b3, w4, b4)

    return tuple(outs)


def siamese_net(x1, x2, kparams, *, block_m=512):
    """SiameseNet.forward: shared-weight embedding of both inputs."""
    if x1.shape == x2.shape:
        o1, o2 = _embed_towers((x1, x2), kparams, block_m=block_m)
        return o1, o2
    (o1,) = _embed_towers((x1,), kparams, block_m=block_m)
    (o2,) = _embed_towers((x2,), kparams, block_m=block_m)
    return o1, o2


def get_embedding(x, kparams, *, block_m=512):
    """SiameseNet.get_embedding."""
    (o,) = _embed_towers((x,), kparams, block_m=block_m)
    return o


def init_params(key):
    """PyTorch-like f32 init: Linear uniform(-1/sqrt(fan_in), 1/sqrt(fan_in)),
    PReLU slope 0.25."""
    dims = [(DIM_IN, H1), (H1, H2), (H2, H3), (H3, DIM_OUT)]
    keys = jax.random.split(key, 2 * len(dims))
    layers = []
    for idx, (fan_in, fan_out) in enumerate(dims):
        bound = 1.0 / (fan_in ** 0.5)
        w = jax.random.uniform(keys[2 * idx], (fan_in, fan_out),
                               jnp.float32, -bound, bound)
        b = jax.random.uniform(keys[2 * idx + 1], (1, fan_out),
                               jnp.float32, -bound, bound)
        layers.append((w, b))
    alphas = jnp.full((3,), 0.25, dtype=jnp.float32)
    return (*layers, alphas)


def prepare_params(params):
    """One-time conversion to the kernel-ready pytree (hoists the bf16 weight
    cast out of the per-forward path). Biases and PReLU slopes stay f32."""
    (w1, b1), (w2, b2), (w3, b3), (w4, b4), alphas = params
    bf = jnp.bfloat16
    return ((w1.astype(bf), b1.astype(jnp.float32)),
            (w2.astype(bf), b2.astype(jnp.float32)),
            (w3.astype(bf), b3.astype(jnp.float32)),
            (w4.astype(bf), b4.astype(jnp.float32)),
            alphas.astype(jnp.float32))


def reference_f32(x, params):
    """True f32 PyTorch semantics (no bf16 anywhere) for validation."""
    (w1, b1), (w2, b2), (w3, b3), (w4, b4), a = params
    h = x @ w1 + b1
    h = jnp.where(h > 0, h, a[0] * h)
    h = h @ w2 + b2
    h = jnp.where(h > 0, h, a[1] * h)
    h = h @ w3 + b3
    h = jnp.where(h > 0, h, a[2] * h)
    return h @ w4 + b4


if __name__ == "__main__":
    key = jax.random.PRNGKey(0)
    pkey, k1, k2 = jax.random.split(key, 3)

    params = init_params(pkey)          # f32 "PyTorch" params
    kparams = prepare_params(params)    # kernel-ready params (bf16 weights)

    B = 16
    x1 = jax.random.normal(k1, (B, DIM_IN), dtype=jnp.float32)
    x2 = jax.random.normal(k2, (B, DIM_IN), dtype=jnp.float32)

    o1, o2 = jax.block_until_ready(siamese_net(x1, x2, kparams))
    e1 = jax.block_until_ready(get_embedding(x1, kparams))

    r1 = reference_f32(x1, params)
    r2 = reference_f32(x2, params)

    assert o1.shape == (B, DIM_OUT) and o2.shape == (B, DIM_OUT)
    # Validate against the true f32 module (bf16 weights => ~1% drift).
    assert jnp.allclose(o1, r1, atol=2e-2, rtol=2e-2), "x1 tower mismatch vs f32 ref"
    assert jnp.allclose(o2, r2, atol=2e-2, rtol=2e-2), "x2 tower mismatch vs f32 ref"
    # Single-tower path must agree with the fused two-tower path.
    assert jnp.allclose(e1, o1, atol=1e-5, rtol=1e-5), "get_embedding mismatch"

    print("KERNEL_OK")
</pallas_src>

<mosaic_0001>
module attributes {stable_mosaic.version = 11 : i64} {
  func.func @kernel(%arg0: i32, %arg1: memref<3xf32, #tpu.memory_space<smem>>, %arg2: memref<16x300xf32, #tpu.memory_space<vmem>>, %arg3: memref<16x300xf32, #tpu.memory_space<vmem>>, %arg4: memref<300x256xbf16, #tpu.memory_space<vmem>>, %arg5: memref<1x256xf32, #tpu.memory_space<vmem>>, %arg6: memref<256x256xbf16, #tpu.memory_space<vmem>>, %arg7: memref<1x256xf32, #tpu.memory_space<vmem>>, %arg8: memref<256x128xbf16, #tpu.memory_space<vmem>>, %arg9: memref<1x128xf32, #tpu.memory_space<vmem>>, %arg10: memref<128x64xbf16, #tpu.memory_space<vmem>>, %arg11: memref<1x64xf32, #tpu.memory_space<vmem>>, %arg12: memref<16x64xf32, #tpu.memory_space<vmem>>, %arg13: memref<16x64xf32, #tpu.memory_space<vmem>>) attributes {dimension_semantics = [#tpu.dimension_semantics<parallel>], iteration_bounds = array<i64: 1>, scalar_prefetch = 0 : i64, scratch_operands = 0 : i64, tpu.core_type = #tpu.core_type<tc>, window_params = [{transform_indices = @transform_0, window_bounds = array<i64: 3>}, {transform_indices = @transform_1, window_bounds = array<i64: 16, 300>}, {transform_indices = @transform_2, window_bounds = array<i64: 16, 300>}, {pipeline_mode = #tpu.pipeline_mode<synchronous>, transform_indices = @transform_3, window_bounds = array<i64: 300, 256>}, {pipeline_mode = #tpu.pipeline_mode<synchronous>, transform_indices = @transform_4, window_bounds = array<i64: 1, 256>}, {pipeline_mode = #tpu.pipeline_mode<synchronous>, transform_indices = @transform_5, window_bounds = array<i64: 256, 256>}, {pipeline_mode = #tpu.pipeline_mode<synchronous>, transform_indices = @transform_6, window_bounds = array<i64: 1, 256>}, {pipeline_mode = #tpu.pipeline_mode<synchronous>, transform_indices = @transform_7, window_bounds = array<i64: 256, 128>}, {pipeline_mode = #tpu.pipeline_mode<synchronous>, transform_indices = @transform_8, window_bounds = array<i64: 1, 128>}, {pipeline_mode = #tpu.pipeline_mode<synchronous>, transform_indices = @transform_9, window_bounds = array<i64: 128, 64>}, {pipeline_mode = #tpu.pipeline_mode<synchronous>, transform_indices = @transform_10, window_bounds = array<i64: 1, 64>}, {transform_indices = @transform_11, window_bounds = array<i64: 16, 64>}, {transform_indices = @transform_12, window_bounds = array<i64: 16, 64>}]} {
    %c0 = arith.constant 0 : index
    %0 = memref.load %arg1[%c0] : memref<3xf32, #tpu.memory_space<smem>>
    %c1 = arith.constant 1 : index
    %1 = memref.load %arg1[%c1] : memref<3xf32, #tpu.memory_space<smem>>
    %c2 = arith.constant 2 : index
    %2 = memref.load %arg1[%c2] : memref<3xf32, #tpu.memory_space<smem>>
    %c0_0 = arith.constant 0 : index
    %c0_1 = arith.constant 0 : index
    %3 = vector.load %arg2[%c0_0, %c0_1] : memref<16x300xf32, #tpu.memory_space<vmem>>, vector<16x300xf32>
    %4 = arith.truncf %3 : vector<16x300xf32> to vector<16x300xbf16>
    %c0_2 = arith.constant 0 : index
    %c0_3 = arith.constant 0 : index
    %5 = vector.load %arg4[%c0_2, %c0_3] : memref<300x256xbf16, #tpu.memory_space<vmem>>, vector<300x256xbf16>
    %cst = arith.constant dense<0.000000e+00> : vector<16x256xf32>
    %6 = tpu.matmul %4, %5, %cst {dimension_numbers = #tpu.dot_dimension_numbers<[1], [0], [0], [1], [0, 0, 1, 1], [], []>} : vector<16x300xbf16>, vector<300x256xbf16>, vector<16x256xf32> -> vector<16x256xf32>
    %c0_4 = arith.constant 0 : index
    %c0_5 = arith.constant 0 : index
    %7 = vector.load %arg5[%c0_4, %c0_5] : memref<1x256xf32, #tpu.memory_space<vmem>>, vector<1x256xf32>
    %8 = vector.broadcast %7 : vector<1x256xf32> to vector<16x256xf32>
    %9 = arith.addf %6, %8 : vector<16x256xf32>
    %cst_6 = arith.constant 0.000000e+00 : f32
    %10 = vector.broadcast %cst_6 : f32 to vector<16x256xf32>
    %11 = arith.cmpf ogt, %9, %10 : vector<16x256xf32>
    %12 = vector.broadcast %0 : f32 to vector<16x256xf32>
    %13 = arith.mulf %12, %9 : vector<16x256xf32>
    %14 = arith.select %11, %9, %13 : vector<16x256xi1>, vector<16x256xf32>
    %15 = arith.truncf %14 : vector<16x256xf32> to vector<16x256xbf16>
    %c0_7 = arith.constant 0 : index
    %c0_8 = arith.constant 0 : index
    %16 = vector.load %arg6[%c0_7, %c0_8] : memref<256x256xbf16, #tpu.memory_space<vmem>>, vector<256x256xbf16>
    %cst_9 = arith.constant dense<0.000000e+00> : vector<16x256xf32>
    %17 = tpu.matmul %15, %16, %cst_9 {dimension_numbers = #tpu.dot_dimension_numbers<[1], [0], [0], [1], [0, 0, 1, 1], [], []>} : vector<16x256xbf16>, vector<256x256xbf16>, vector<16x256xf32> -> vector<16x256xf32>
    %c0_10 = arith.constant 0 : index
    %c0_11 = arith.constant 0 : index
    %18 = vector.load %arg7[%c0_10, %c0_11] : memref<1x256xf32, #tpu.memory_space<vmem>>, vector<1x256xf32>
    %19 = vector.broadcast %18 : vector<1x256xf32> to vector<16x256xf32>
    %20 = arith.addf %17, %19 : vector<16x256xf32>
    %cst_12 = arith.constant 0.000000e+00 : f32
    %21 = vector.broadcast %cst_12 : f32 to vector<16x256xf32>
    %22 = arith.cmpf ogt, %20, %21 : vector<16x256xf32>
    %23 = vector.broadcast %1 : f32 to vector<16x256xf32>
    %24 = arith.mulf %23, %20 : vector<16x256xf32>
    %25 = arith.select %22, %20, %24 : vector<16x256xi1>, vector<16x256xf32>
    %26 = arith.truncf %25 : vector<16x256xf32> to vector<16x256xbf16>
    %c0_13 = arith.constant 0 : index
    %c0_14 = arith.constant 0 : index
    %27 = vector.load %arg8[%c0_13, %c0_14] : memref<256x128xbf16, #tpu.memory_space<vmem>>, vector<256x128xbf16>
    %cst_15 = arith.constant dense<0.000000e+00> : vector<16x128xf32>
    %28 = tpu.matmul %26, %27, %cst_15 {dimension_numbers = #tpu.dot_dimension_numbers<[1], [0], [0], [1], [0, 0, 1, 1], [], []>} : vector<16x256xbf16>, vector<256x128xbf16>, vector<16x128xf32> -> vector<16x128xf32>
    %c0_16 = arith.constant 0 : index
    %c0_17 = arith.constant 0 : index
    %29 = vector.load %arg9[%c0_16, %c0_17] : memref<1x128xf32, #tpu.memory_space<vmem>>, vector<1x128xf32>
    %30 = vector.broadcast %29 : vector<1x128xf32> to vector<16x128xf32>
    %31 = arith.addf %28, %30 : vector<16x128xf32>
    %cst_18 = arith.constant 0.000000e+00 : f32
    %32 = vector.broadcast %cst_18 : f32 to vector<16x128xf32>
    %33 = arith.cmpf ogt, %31, %32 : vector<16x128xf32>
    %34 = vector.broadcast %2 : f32 to vector<16x128xf32>
    %35 = arith.mulf %34, %31 : vector<16x128xf32>
    %36 = arith.select %33, %31, %35 : vector<16x128xi1>, vector<16x128xf32>
    %37 = arith.truncf %36 : vector<16x128xf32> to vector<16x128xbf16>
    %c0_19 = arith.constant 0 : index
    %c0_20 = arith.constant 0 : index
    %38 = vector.load %arg10[%c0_19, %c0_20] : memref<128x64xbf16, #tpu.memory_space<vmem>>, vector<128x64xbf16>
    %cst_21 = arith.constant dense<0.000000e+00> : vector<16x64xf32>
    %39 = tpu.matmul %37, %38, %cst_21 {dimension_numbers = #tpu.dot_dimension_numbers<[1], [0], [0], [1], [0, 0, 1, 1], [], []>} : vector<16x128xbf16>, vector<128x64xbf16>, vector<16x64xf32> -> vector<16x64xf32>
    %c0_22 = arith.constant 0 : index
    %c0_23 = arith.constant 0 : index
    %40 = vector.load %arg11[%c0_22, %c0_23] : memref<1x64xf32, #tpu.memory_space<vmem>>, vector<1x64xf32>
    %41 = vector.broadcast %40 : vector<1x64xf32> to vector<16x64xf32>
    %42 = arith.addf %39, %41 : vector<16x64xf32>
    %c0_24 = arith.constant 0 : index
    %c0_25 = arith.constant 0 : index
    %43 = vector.load %arg12[%c0_24, %c0_25] : memref<16x64xf32, #tpu.memory_space<vmem>>, vector<16x64xf32>
    tpu.vector_store %arg12[%c0_24, %c0_25], %42 {strides = array<i32>} : memref<16x64xf32, #tpu.memory_space<vmem>>, vector<16x64xf32>,
    %c0_26 = arith.constant 0 : index
    %c0_27 = arith.constant 0 : index
    %44 = vector.load %arg3[%c0_26, %c0_27] : memref<16x300xf32, #tpu.memory_space<vmem>>, vector<16x300xf32>
    %45 = arith.truncf %44 : vector<16x300xf32> to vector<16x300xbf16>
    %c0_28 = arith.constant 0 : index
    %c0_29 = arith.constant 0 : index
    %46 = vector.load %arg4[%c0_28, %c0_29] : memref<300x256xbf16, #tpu.memory_space<vmem>>, vector<300x256xbf16>
    %cst_30 = arith.constant dense<0.000000e+00> : vector<16x256xf32>
    %47 = tpu.matmul %45, %46, %cst_30 {dimension_numbers = #tpu.dot_dimension_numbers<[1], [0], [0], [1], [0, 0, 1, 1], [], []>} : vector<16x300xbf16>, vector<300x256xbf16>, vector<16x256xf32> -> vector<16x256xf32>
    %c0_31 = arith.constant 0 : index
    %c0_32 = arith.constant 0 : index
    %48 = vector.load %arg5[%c0_31, %c0_32] : memref<1x256xf32, #tpu.memory_space<vmem>>, vector<1x256xf32>
    %49 = vector.broadcast %48 : vector<1x256xf32> to vector<16x256xf32>
    %50 = arith.addf %47, %49 : vector<16x256xf32>
    %cst_33 = arith.constant 0.000000e+00 : f32
    %51 = vector.broadcast %cst_33 : f32 to vector<16x256xf32>
    %52 = arith.cmpf ogt, %50, %51 : vector<16x256xf32>
    %53 = vector.broadcast %0 : f32 to vector<16x256xf32>
    %54 = arith.mulf %53, %50 : vector<16x256xf32>
    %55 = arith.select %52, %50, %54 : vector<16x256xi1>, vector<16x256xf32>
    %56 = arith.truncf %55 : vector<16x256xf32> to vector<16x256xbf16>
    %c0_34 = arith.constant 0 : index
    %c0_35 = arith.constant 0 : index
    %57 = vector.load %arg6[%c0_34, %c0_35] : memref<256x256xbf16, #tpu.memory_space<vmem>>, vector<256x256xbf16>
    %cst_36 = arith.constant dense<0.000000e+00> : vector<16x256xf32>
    %58 = tpu.matmul %56, %57, %cst_36 {dimension_numbers = #tpu.dot_dimension_numbers<[1], [0], [0], [1], [0, 0, 1, 1], [], []>} : vector<16x256xbf16>, vector<256x256xbf16>, vector<16x256xf32> -> vector<16x256xf32>
    %c0_37 = arith.constant 0 : index
    %c0_38 = arith.constant 0 : index
    %59 = vector.load %arg7[%c0_37, %c0_38] : memref<1x256xf32, #tpu.memory_space<vmem>>, vector<1x256xf32>
    %60 = vector.broadcast %59 : vector<1x256xf32> to vector<16x256xf32>
    %61 = arith.addf %58, %60 : vector<16x256xf32>
    %cst_39 = arith.constant 0.000000e+00 : f32
    %62 = vector.broadcast %cst_39 : f32 to vector<16x256xf32>
    %63 = arith.cmpf ogt, %61, %62 : vector<16x256xf32>
    %64 = vector.broadcast %1 : f32 to vector<16x256xf32>
    %65 = arith.mulf %64, %61 : vector<16x256xf32>
    %66 = arith.select %63, %61, %65 : vector<16x256xi1>, vector<16x256xf32>
    %67 = arith.truncf %66 : vector<16x256xf32> to vector<16x256xbf16>
    %c0_40 = arith.constant 0 : index
    %c0_41 = arith.constant 0 : index
    %68 = vector.load %arg8[%c0_40, %c0_41] : memref<256x128xbf16, #tpu.memory_space<vmem>>, vector<256x128xbf16>
    %cst_42 = arith.constant dense<0.000000e+00> : vector<16x128xf32>
    %69 = tpu.matmul %67, %68, %cst_42 {dimension_numbers = #tpu.dot_dimension_numbers<[1], [0], [0], [1], [0, 0, 1, 1], [], []>} : vector<16x256xbf16>, vector<256x128xbf16>, vector<16x128xf32> -> vector<16x128xf32>
    %c0_43 = arith.constant 0 : index
    %c0_44 = arith.constant 0 : index
    %70 = vector.load %arg9[%c0_43, %c0_44] : memref<1x128xf32, #tpu.memory_space<vmem>>, vector<1x128xf32>
    %71 = vector.broadcast %70 : vector<1x128xf32> to vector<16x128xf32>
    %72 = arith.addf %69, %71 : vector<16x128xf32>
    %cst_45 = arith.constant 0.000000e+00 : f32
    %73 = vector.broadcast %cst_45 : f32 to vector<16x128xf32>
    %74 = arith.cmpf ogt, %72, %73 : vector<16x128xf32>
    %75 = vector.broadcast %2 : f32 to vector<16x128xf32>
    %76 = arith.mulf %75, %72 : vector<16x128xf32>
    %77 = arith.select %74, %72, %76 : vector<16x128xi1>, vector<16x128xf32>
    %78 = arith.truncf %77 : vector<16x128xf32> to vector<16x128xbf16>
    %c0_46 = arith.constant 0 : index
    %c0_47 = arith.constant 0 : index
    %79 = vector.load %arg10[%c0_46, %c0_47] : memref<128x64xbf16, #tpu.memory_space<vmem>>, vector<128x64xbf16>
    %cst_48 = arith.constant dense<0.000000e+00> : vector<16x64xf32>
    %80 = tpu.matmul %78, %79, %cst_48 {dimension_numbers = #tpu.dot_dimension_numbers<[1], [0], [0], [1], [0, 0, 1, 1], [], []>} : vector<16x128xbf16>, vector<128x64xbf16>, vector<16x64xf32> -> vector<16x64xf32>
    %c0_49 = arith.constant 0 : index
    %c0_50 = arith.constant 0 : index
    %81 = vector.load %arg11[%c0_49, %c0_50] : memref<1x64xf32, #tpu.memory_space<vmem>>, vector<1x64xf32>
    %82 = vector.broadcast %81 : vector<1x64xf32> to vector<16x64xf32>
    %83 = arith.addf %80, %82 : vector<16x64xf32>
    %c0_51 = arith.constant 0 : index
    %c0_52 = arith.constant 0 : index
    %84 = vector.load %arg13[%c0_51, %c0_52] : memref<16x64xf32, #tpu.memory_space<vmem>>, vector<16x64xf32>
    tpu.vector_store %arg13[%c0_51, %c0_52], %83 {strides = array<i32>} : memref<16x64xf32, #tpu.memory_space<vmem>>, vector<16x64xf32>,
    return
  }
  func.func @transform_0(%arg0: i32) -> i32 {
    %c0_i32 = arith.constant 0 : i32
    %c0_i32_0 = arith.constant 0 : i32
    return %c0_i32 : i32
  }
  func.func @transform_1(%arg0: i32) -> (i32, i32) {
    %c0_i32 = arith.constant 0 : i32
    %c0_i32_0 = arith.constant 0 : i32
    return %arg0, %c0_i32 : i32, i32
  }
  func.func @transform_2(%arg0: i32) -> (i32, i32) {
    %c0_i32 = arith.constant 0 : i32
    %c0_i32_0 = arith.constant 0 : i32
    return %arg0, %c0_i32 : i32, i32
  }
  func.func @transform_3(%arg0: i32) -> (i32, i32) {
    %c0_i32 = arith.constant 0 : i32
    %c0_i32_0 = arith.constant 0 : i32
    %c0_i32_1 = arith.constant 0 : i32
    return %c0_i32, %c0_i32_0 : i32, i32
  }
  func.func @transform_4(%arg0: i32) -> (i32, i32) {
    %c0_i32 = arith.constant 0 : i32
    %c0_i32_0 = arith.constant 0 : i32
    %c0_i32_1 = arith.constant 0 : i32
    return %c0_i32, %c0_i32_0 : i32, i32
  }
  func.func @transform_5(%arg0: i32) -> (i32, i32) {
    %c0_i32 = arith.constant 0 : i32
    %c0_i32_0 = arith.constant 0 : i32
    %c0_i32_1 = arith.constant 0 : i32
    return %c0_i32, %c0_i32_0 : i32, i32
  }
  func.func @transform_6(%arg0: i32) -> (i32, i32) {
    %c0_i32 = arith.constant 0 : i32
    %c0_i32_0 = arith.constant 0 : i32
    %c0_i32_1 = arith.constant 0 : i32
    return %c0_i32, %c0_i32_0 : i32, i32
  }
  func.func @transform_7(%arg0: i32) -> (i32, i32) {
    %c0_i32 = arith.constant 0 : i32
    %c0_i32_0 = arith.constant 0 : i32
    %c0_i32_1 = arith.constant 0 : i32
    return %c0_i32, %c0_i32_0 : i32, i32
  }
  func.func @transform_8(%arg0: i32) -> (i32, i32) {
    %c0_i32 = arith.constant 0 : i32
    %c0_i32_0 = arith.constant 0 : i32
    %c0_i32_1 = arith.constant 0 : i32
    return %c0_i32, %c0_i32_0 : i32, i32
  }
  func.func @transform_9(%arg0: i32) -> (i32, i32) {
    %c0_i32 = arith.constant 0 : i32
    %c0_i32_0 = arith.constant 0 : i32
    %c0_i32_1 = arith.constant 0 : i32
    return %c0_i32, %c0_i32_0 : i32, i32
  }
  func.func @transform_10(%arg0: i32) -> (i32, i32) {
    %c0_i32 = arith.constant 0 : i32
    %c0_i32_0 = arith.constant 0 : i32
    %c0_i32_1 = arith.constant 0 : i32
    return %c0_i32, %c0_i32_0 : i32, i32
  }
  func.func @transform_11(%arg0: i32) -> (i32, i32) {
    %c0_i32 = arith.constant 0 : i32
    %c0_i32_0 = arith.constant 0 : i32
    return %arg0, %c0_i32 : i32, i32
  }
  func.func @transform_12(%arg0: i32) -> (i32, i32) {
    %c0_i32 = arith.constant 0 : i32
    %c0_i32_0 = arith.constant 0 : i32
    return %arg0, %c0_i32 : i32, i32
  }
}

</mosaic_0001>

<bundles_post_ra>
// kernel: tpu_custom_call.1
= control target key start
LH: loop header
LB: loop body
LE: loop exit
PB: predicated region body
PF: predicated region fallthrough
CT: control target
= control target key end

     0   :  { %18 = vsyncpa [#allocation5], 0  ;;  %s3302_s0 = inlined_call_operand.hbm [shape: f32[3], index: 0, kind: input, shape index: {}]   ;;  %s3303_s1 = inlined_call_operand.vmem [shape: f32[16,300], index: 1, kind: input, shape index: {}]   ;;  %s3304_s2 = inlined_call_operand.vmem [shape: f32[16,300], index: 2, kind: input, shape index: {}]   ;;  %s3305_s3 = inlined_call_operand.hbm [shape: bf16[300,256], index: 3, kind: input, shape index: {}]   ;;  %s3306_s4 = inlined_call_operand.vmem [shape: f32[1,256], index: 4, kind: input, shape index: {}]   ;;  %s3307_s5 = inlined_call_operand.hbm [shape: bf16[256,256], index: 5, kind: input, shape index: {}]   ;;  %s3308_s6 = inlined_call_operand.hbm [shape: f32[1,256], index: 6, kind: input, shape index: {}]   ;;  %s3309_s7 = inlined_call_operand.hbm [shape: bf16[256,128], index: 7, kind: input, shape index: {}]   ;;  %s3310_s8 = inlined_call_operand.hbm [shape: f32[1,128], index: 8, kind: input, shape index: {}]   ;;  %s3311_s9 = inlined_call_operand.vmem [shape: bf16[128,64], index: 9, kind: input, shape index: {}]   ;;  %s3312_s10 = inlined_call_operand.vmem [shape: f32[1,64], index: 10, kind: input, shape index: {}]   ;;  %s3313_s11 = inlined_call_operand.hbm [shape: f32[16,64], index: 11, kind: output, shape index: {0}]   ;;  %s3314_s12 = inlined_call_operand.hbm [shape: f32[16,64], index: 12, kind: output, shape index: {1}]  }
   0x1   :  { %19 = vsyncpa [#allocation3], 0 }
   0x2   :  { %20 = vsyncpa [#allocation8], 0 }
   0x3   :  { %21 = vsyncpa [#allocation11], 0 }
   0x4   :  { %22 = vsyncpa [#allocation4], 0 }
   0x5   :  { %23 = vsyncpa [#allocation15], 0  ;;  %s2652_s21 = smov [#allocation7]   ;;  %s2653_s23 = smov [#allocation10]  }
   0x6   :  { %s55_s22 = sshll.u32 %s2652_s21, 4  ;;  %s77_s24 = sshll.u32 %s2653_s23, 4  ;;  %s56_s22 = int_to_ptr.vmem [resolvable:$true] %s55_s22  ;;  %s2732_s24 = int_to_ptr.vmem [resolvable:$true] %s77_s24 }
   0x7   :  { %s2476_s27 = scalar_lea.hbm %s3307_s5, 4096 }
   0x8   :  { %p2477_p0 = scmp.ne.s32.totalorder %s3307_s5, %s2476_s27  ;;  %p2480_p1 = scmp.lt.u32.totalorder %s2476_s27, %s3307_s5 }
   0xa   :  { %p2482_p2 = pnand %p2480_p1, %p2477_p0 }
   0xc   :  { %2485 = shalt.err (!%p2482_p2)
}
   0xd   :  { %s2486_s14 = scalar_lea.vmem %s56_s22, 4096  ;;  %p2491_p4 = scmp.lt.s32.totalorder %s56_s22, %s56_s22 }
   0xe   :  { %p2487_p3 = scmp.ne.s32.totalorder %s56_s22, %s2486_s14  ;;  %p2492_p5 = scmp.lt.s32.totalorder %s2486_s14, %s2486_s14 }
  0x10   :  { %p2493_p6 = por %p2492_p5, %p2491_p4 }
  0x12   :  { %p2494_p7 = pnand %p2493_p6, %p2487_p3 }
  0x14   :  { %2497 = shalt.err (!%p2494_p7)
}
  0x15   :  { %s2654_s15 = smov 128   ;;  %s2655_s16 = smov 8  }
  0x16   :  { %61 = dma.hbm_to_vmem [thread:$0]  %s3307_s5, 4096, %s56_s22, [#allocation8], %s2654_s15, %s2654_s15, %s2655_s16  }
  0x17   :  { %s2498_s21 = scalar_lea.hbm %s3309_s7, 2048 }
  0x18   :  { %p2499_p8 = scmp.ne.s32.totalorder %s3309_s7, %s2498_s21  ;;  %p2502_p9 = scmp.lt.u32.totalorder %s2498_s21, %s3309_s7 }
  0x1a   :  { %p2504_p10 = pnand %p2502_p9, %p2499_p8 }
  0x1c   :  { %2507 = shalt.err (!%p2504_p10)
}
  0x1d   :  { %s2508_s28 = scalar_lea.vmem %s2732_s24, 2048  ;;  %p2513_p12 = scmp.lt.s32.totalorder %s2732_s24, %s2732_s24 }
  0x1e   :  { %p2509_p11 = scmp.ne.s32.totalorder %s2732_s24, %s2508_s28  ;;  %p2514_p13 = scmp.lt.s32.totalorder %s2508_s28, %s2508_s28 }
  0x20   :  { %p2515_p0 = por %p2514_p13, %p2513_p12 }
  0x22   :  { %p2516_p1 = pnand %p2515_p0, %p2509_p11 }
  0x24   :  { %2519 = shalt.err (!%p2516_p1)
}
  0x25   :  { %s2656_s5 = smov 64   ;;  %s2657_s22 = smov 4  }
  0x26   :  { %83 = dma.hbm_to_vmem [thread:$0]  %s3309_s7, 2048, %s2732_s24, [#allocation11], %s2656_s5, %s2656_s5, %s2657_s22  }
  0x27   :  { %s2520_s17 = scalar_lea.hbm %s3302_s0, 16 }
  0x28   :  { %p2521_p2 = scmp.ne.s32.totalorder %s3302_s0, %s2520_s17  ;;  %p2524_p3 = scmp.lt.u32.totalorder %s2520_s17, %s3302_s0 }
  0x2a   :  { %p2526_p4 = pnand %p2524_p3, %p2521_p2 }
  0x2c   :  { %2529 = shalt.err (!%p2526_p4)
}
  0x2d   :  { %s2658_s23 = smov [#allocation2]   ;;  %s2659_s7 = smov [#allocation6]  }
  0x2e   :  { %31 = dma.hbm_to_smem %s3302_s0, 16, %s2658_s23, [#allocation5]  }
  0x2f   :  { %s41_s24 = sshll.u32 %s2659_s7, 4  ;;  %s2660_s27 = smov [#allocation9]   ;;  %s42_s24 = int_to_ptr.vmem [resolvable:$true] %s41_s24 }
  0x30   :  { %s68_s28 = sshll.u32 %s2660_s27, 4  ;;  %s2530_s29 = scalar_lea.hbm %s3305_s3, 4864  ;;  %s69_s28 = int_to_ptr.vmem [resolvable:$true] %s68_s28 }
  0x31   :  { %p2531_p5 = scmp.ne.s32.totalorder %s3305_s3, %s2530_s29  ;;  %p2534_p6 = scmp.lt.u32.totalorder %s2530_s29, %s3305_s3 }
  0x33   :  { %p2536_p7 = pnand %p2534_p6, %p2531_p5 }
  0x35   :  { %2539 = shalt.err (!%p2536_p7)
}
  0x36   :  { %s2540_s0 = scalar_lea.vmem %s42_s24, 4864  ;;  %p2545_p9 = scmp.lt.s32.totalorder %s42_s24, %s42_s24 }
  0x37   :  { %p2541_p8 = scmp.ne.s32.totalorder %s42_s24, %s2540_s0  ;;  %p2546_p10 = scmp.lt.s32.totalorder %s2540_s0, %s2540_s0 }
  0x39   :  { %p2547_p11 = por %p2546_p10, %p2545_p9 }
  0x3b   :  { %p2548_p12 = pnand %p2547_p11, %p2541_p8 }
  0x3d   :  { %2551 = shalt.err (!%p2548_p12)
}
  0x3e   :  { %47 = dma.hbm_to_vmem [thread:$0]  %s3305_s3, 4864, %s42_s24, [#allocation3], %s2654_s15, %s2654_s15, %s2655_s16  }
  0x3f   :  { %s2552_s23 = scalar_lea.hbm %s3308_s6, 32 }
  0x40   :  { %p2553_p13 = scmp.ne.s32.totalorder %s3308_s6, %s2552_s23  ;;  %p2556_p0 = scmp.lt.u32.totalorder %s2552_s23, %s3308_s6 }
  0x42   :  { %p2558_p1 = pnand %p2556_p0, %p2553_p13 }
  0x44   :  { %2561 = shalt.err (!%p2558_p1)
}
  0x45   :  { %s2562_s5 = scalar_lea.vmem %s69_s28, 32  ;;  %p2567_p3 = scmp.lt.s32.totalorder %s69_s28, %s69_s28 }
  0x46   :  { %p2563_p2 = scmp.ne.s32.totalorder %s69_s28, %s2562_s5  ;;  %p2568_p4 = scmp.lt.s32.totalorder %s2562_s5, %s2562_s5 }
  0x48   :  { %p2569_p5 = por %p2568_p4, %p2567_p3 }
  0x4a   :  { %p2570_p6 = pnand %p2569_p5, %p2563_p2 }
  0x4c   :  { %2573 = shalt.err (!%p2570_p6)
}
  0x4d   :  { %71 = dma.hbm_to_vmem [thread:$0]  %s3308_s6, 32, %s69_s28, [#allocation8]  }
  0x4e   :  { %s2661_s22 = smov [#allocation12]   ;;  %s2574_s14 = scalar_lea.hbm %s3310_s8, 16 }
  0x4f   :  { %s90_s29 = sshll.u32 %s2661_s22, 4  ;;  %p2575_p7 = scmp.ne.s32.totalorder %s3310_s8, %s2574_s14  ;;  %s91_s29 = int_to_ptr.vmem [resolvable:$true] %s90_s29 }
  0x50   :  { %p2578_p8 = scmp.lt.u32.totalorder %s2574_s14, %s3310_s8 }
  0x52   :  { %p2580_p9 = pnand %p2578_p8, %p2575_p7 }
  0x54   :  { %2583 = shalt.err (!%p2580_p9)
}
  0x55   :  { %s2584_s20 = scalar_lea.vmem %s91_s29, 16  ;;  %s2588_s6 = scalar_lea.vmem %s91_s29, 32 }
  0x56   :  { %p2585_p10 = scmp.ne.s32.totalorder %s91_s29, %s2584_s20  ;;  %p2589_p11 = scmp.lt.s32.totalorder %s91_s29, %s91_s29 }
  0x57   :  { %p2590_p12 = scmp.lt.s32.totalorder %s2588_s6, %s2584_s20 }
  0x59   :  { %p2591_p13 = por %p2590_p12, %p2589_p11 }
  0x5b   :  { %p2592_p0 = pnand %p2591_p13, %p2585_p10 }
  0x5d   :  { %2595 = shalt.err (!%p2592_p0)
}
  0x5e   :  { %93 = dma.hbm_to_vmem [thread:$0]  %s3310_s8, 16, %s91_s29, [#allocation11]  }
  0x5f   :  { %2640 = dma.done.wait [#allocation5], 16  }
  0x60   :  { %2641 = vsyncadd [#allocation5], 4294967280 }
  0x61   :  { %2642 = dma.done.wait [#allocation3], 4864  }
  0x62   :  { %2643 = vsyncadd [#allocation3], 4294962432 }
  0x63   :  { %2644 = dma.done.wait [#allocation8], 4128  }
  0x64   :  { %2645 = vsyncadd [#allocation8], 4294963168 }
  0x65   :  { %2646 = dma.done.wait [#allocation11], 2064  }
  0x66   :  { %2647 = vsyncadd [#allocation11], 4294965232 }
  0x67   :  { %116 = sfence }
  0x68   :  { %v2817_v0 = vld [vmem:[#allocation6 + $0x4] ss:$8 sps:$4 sm:$0xff]   ;;  %v2819_v1 = vld [vmem:[#allocation6] ss:$8 sps:$4 sm:$0xff]   ;;  %v2822_v2 = vld [vmem:[#allocation6 + $0x14] ss:$8 sps:$4 sm:$0xff]  }
  0x69   :  { %379 = vmatprep.subr.bf16.mxu0 %v2817_v0  ;;  %v2825_v3 = vld [vmem:[#allocation6 + $0x10] ss:$8 sps:$4 sm:$0xff]   ;;  %v2828_v4 = vld [vmem:[#allocation6 + $0x24] ss:$8 sps:$4 sm:$0xff]   ;;  %v2831_v5 = vld [vmem:[#allocation6 + $0x20] ss:$8 sps:$4 sm:$0xff]  }
  0x6a   :  { %380 = vmatpush1.bf16.msra.mxu0 %v2819_v1  ;;  %v2834_v6 = vld [vmem:[#allocation6 + $0x34] ss:$8 sps:$4 sm:$0xff]   ;;  %v2837_v7 = vld [vmem:[#allocation6 + $0x30] ss:$8 sps:$4 sm:$0xff]   ;;  %v2840_v8 = vld [vmem:[#allocation6 + $0x44] ss:$8 sps:$4 sm:$0xff]  }
  0x6b   :  { %381 = vmatprep.subr.bf16.mxu0 %v2822_v2  ;;  %v2843_v9 = vld [vmem:[#allocation6 + $0x40] ss:$8 sps:$4 sm:$0xff]   ;;  %v2846_v10 = vld [vmem:[#allocation6 + $0x54] ss:$8 sps:$4 sm:$0xff]   ;;  %v2849_v11 = vld [vmem:[#allocation6 + $0x50] ss:$8 sps:$4 sm:$0xff]  }
  0x6c   :  { %v2852_v12 = vld [vmem:[#allocation6 + $0x64] ss:$8 sps:$4 sm:$0xff]   ;;  %v2861_v16 = vld [vmem:[#allocation6 + $0x60] ss:$8 sps:$4 sm:$0xff]   ;;  %v2864_v17 = vld [vmem:[#allocation6 + $0x74] ss:$8 sps:$4 sm:$0xff]  }
  0x6d   :  { %v122_v13 = vld [vmem:[%s3303_s1 + $0x8] sm:$0xff]  ;;  %v125_v14 = vld [vmem:[%s3303_s1 + $0x20] sm:$0xff]  ;;  %v2866_v18 = vld [vmem:[#allocation6 + $0x70] ss:$8 sps:$4 sm:$0xff]   ;;  %vm372_vm0 = vcmask 1045504   ;;  %vm368_vm1 = vcmask 359424  }
  0x6e   :  { %382 = vmatpush1.bf16.msra.mxu0 %v2825_v3  ;;  %v128_v15 = vpack.c.bf16 %v125_v14, %v122_v13  ;;  %v2868_v19 = vld [vmem:[#allocation6 + $0x84] ss:$8 sps:$4 sm:$0xff]   ;;  %v2871_v20 = vld [vmem:[#allocation7 + $0x4] ss:$8 sps:$4 sm:$0xff]   ;;  %v2873_v21 = vld [vmem:[#allocation7] ss:$8 sps:$4 sm:$0xff]  }
  0x6f   :  { %383 = vmatprep.subr.bf16.mxu0 %v2828_v4  ;;  %v2876_v22 = vld [vmem:[#allocation7 + $0x14] ss:$8 sps:$4 sm:$0xff]   ;;  %684 = vmatprep.subr.bf16.mxu1 %v2871_v20  ;;  %v2880_v23 = vld [vmem:[#allocation7 + $0x10] ss:$8 sps:$4 sm:$0xff]   ;;  %v2886_v25 = vld [vmem:[#allocation7 + $0x24] ss:$8 sps:$4 sm:$0xff]  }
  0x70   :  { %411 = vmatprep.mubr.bf16.mxu0 %v128_v15  ;;  %685 = vmatpush1.bf16.msra.mxu1 %v2873_v21  ;;  %v2883_v24 = vld [vmem:[#allocation6 + $0x80] ss:$8 sps:$4 sm:$0xff]   ;;  %3346 = vst [vmem:[#allocation22_spill] sm:$0xff] %v2886_v25  ;;  %v2889_v26 = vld [vmem:[#allocation6 + $0x94] ss:$8 sps:$4 sm:$0xff]   ;;  %s1991_s25 = sld [smem:[#allocation2 + $0x1]] }
  0x71   :  { %686 = vmatprep.subr.bf16.mxu1 %v2876_v22  ;;  %v2892_v27 = vld [vmem:[#allocation7 + $0x20] ss:$8 sps:$4 sm:$0xff]   ;;  %v2898_v29 = vld [vmem:[#allocation7 + $0x34] ss:$8 sps:$4 sm:$0xff]   ;;  %v2903_v31 = vld [vmem:[#allocation6 + $0xa0] ss:$8 sps:$4 sm:$0xff]  }
  0x72   :  { %384 = vmatpush1.bf16.msra.mxu0 %v2831_v5  ;;  %3347 = vst [vmem:[#allocation23_spill] sm:$0xff] %v2892_v27  ;;  %v2895_v28 = vld [vmem:[#allocation6 + $0x90] ss:$8 sps:$4 sm:$0xff]   ;;  %3348 = vst [vmem:[#allocation24_spill] sm:$0xff] %v2898_v29  ;;  %v2901_v30 = vld [vmem:[#allocation6 + $0xa4] ss:$8 sps:$4 sm:$0xff]  }
  0x73   :  { %385 = vmatprep.subr.bf16.mxu0 %v2834_v6  ;;  %v2905_v32 = vld [vmem:[#allocation6 + $0x120] sm:$0xff]  ;;  %v2911_v34 = vld [vmem:[#allocation6 + $0x128] sm:$0x33]  ;;  %v2914_v35 = vld [vmem:[#allocation7 + $0x44] ss:$8 sps:$4 sm:$0xff]   ;;  %vm2664_vm10 = vmmov 0  }
  0x74   :  { %687 = vmatpush1.bf16.msra.mxu1 %v2880_v23  ;;  %v2908_v33 = vld [vmem:[#allocation7 + $0x30] ss:$8 sps:$4 sm:$0xff]   ;;  %3350 = vst [vmem:[#allocation26_spill] sm:$0xff] %v2914_v35  ;;  %v2917_v36 = vld [vmem:[#allocation6 + $0xb4] ss:$8 sps:$4 sm:$0xff]   ;;  %v2029_v38 = vcombine.low %v2905_v32, %v2911_v34  ;;  %s1992_s6 = sld [smem:[#allocation2 + $0x2]] }
  0x75   :  { %688 = vmatprep.subr.bf16.mxu1 %v2886_v25  ;;  %3349 = vst [vmem:[#allocation25_spill] sm:$0xff] %v2908_v33  ;;  %v2919_v37 = vld [vmem:[#allocation6 + $0xb0] ss:$8 sps:$4 sm:$0xff]   ;;  %v2927_v40 = vld [vmem:[#allocation6 + $0xc4] ss:$8 sps:$4 sm:$0xff]  }
  0x76   :  { %386 = vmatpush1.bf16.msra.mxu0 %v2837_v7  ;;  %v2924_v39 = vld [vmem:[#allocation7 + $0x40] ss:$8 sps:$4 sm:$0xff]   ;;  %v2930_v41 = vld [vmem:[#allocation7 + $0x54] ss:$8 sps:$4 sm:$0xff]   ;;  %v2933_v42 = vld [vmem:[#allocation7 + $0x50] ss:$8 sps:$4 sm:$0xff]  }
  0x77   :  { %387 = vmatprep.subr.bf16.mxu0 %v2840_v8  ;;  %3351 = vst [vmem:[#allocation27_spill] sm:$0xff] %v2924_v39  ;;  %3352 = vst [vmem:[#allocation28_spill] sm:$0xff] %v2930_v41  ;;  %v2935_v43 = vld [vmem:[#allocation6 + $0xc0] ss:$8 sps:$4 sm:$0xff]   ;;  %v2937_v44 = vld [vmem:[#allocation7 + $0x64] ss:$8 sps:$4 sm:$0xff]  }
  0x78   :  { %689 = vmatpush1.bf16.msra.mxu1 %v2892_v27  ;;  %3353 = vst [vmem:[#allocation29_spill] sm:$0xff] %v2933_v42  ;;  %3354 = vst [vmem:[#allocation30_spill] sm:$0xff] %v2937_v44  ;;  %v2939_v45 = vld [vmem:[#allocation6 + $0xd4] ss:$8 sps:$4 sm:$0xff]   ;;  %v374_v46 = vsel %vm372_vm0, %v2029_v38, 0  ;;  %v121_v57 = vld [vmem:[%s3303_s1] sm:$0xff] }
  0x79   :  { %690 = vmatprep.subr.bf16.mxu1 %v2898_v29  ;;  %v2946_v47 = vld [vmem:[#allocation7 + $0x60] ss:$8 sps:$4 sm:$0xff]   ;;  %v2950_v49 = vld [vmem:[#allocation7 + $0x74] ss:$8 sps:$4 sm:$0xff]   ;;  %v2958_v51 = vld [vmem:[#allocation7 + $0x70] ss:$8 sps:$4 sm:$0xff]  }
  0x7a   :  { %388 = vmatpush1.bf16.msra.mxu0 %v2843_v9  ;;  %3355 = vst [vmem:[#allocation31_spill] sm:$0xff] %v2946_v47  ;;  %v2948_v48 = vld [vmem:[#allocation6 + $0xd0] ss:$8 sps:$4 sm:$0xff]   ;;  %3356 = vst [vmem:[#allocation32_spill] sm:$0xff] %v2950_v49  ;;  %v2952_v50 = vld [vmem:[#allocation6 + $0xe4] ss:$8 sps:$4 sm:$0xff]  }
  0x7b   :  { %389 = vmatprep.subr.bf16.mxu0 %v2846_v10  ;;  %3357 = vst [vmem:[#allocation33_spill] sm:$0xff] %v2958_v51  ;;  %v2960_v52 = vld [vmem:[#allocation6 + $0xe0] ss:$8 sps:$4 sm:$0xff]   ;;  %v2962_v53 = vld [vmem:[#allocation7 + $0x84] ss:$8 sps:$4 sm:$0xff]  }
  0x7c   :  { %691 = vmatpush1.bf16.msra.mxu1 %v2908_v33  ;;  %3358 = vst [vmem:[#allocation34_spill] sm:$0xff] %v2962_v53  ;;  %v2964_v54 = vld [vmem:[#allocation6 + $0xf4] ss:$8 sps:$4 sm:$0xff]   ;;  %v2970_v55 = vld [vmem:[#allocation7 + $0x80] ss:$8 sps:$4 sm:$0xff]  }
  0x7d   :  { %692 = vmatprep.subr.bf16.mxu1 %v2914_v35  ;;  %3359 = vst [vmem:[#allocation35_spill] sm:$0xff] %v2970_v55  ;;  %v2972_v56 = vld [vmem:[#allocation6 + $0xf0] ss:$8 sps:$4 sm:$0xff]   ;;  %v2980_v59 = vld [vmem:[#allocation7 + $0x94] ss:$8 sps:$4 sm:$0xff]  }
  0x7e   :  { %390 = vmatpush1.bf16.msra.mxu0 %v2849_v11  ;;  %v124_v58 = vld [vmem:[%s3303_s1 + $0x18] sm:$0xff]  ;;  %3360 = vst [vmem:[#allocation36_spill] sm:$0xff] %v2980_v59  ;;  %v2982_v60 = vld [vmem:[#allocation6 + $0x104] ss:$8 sps:$4 sm:$0xff]   ;;  %v2988_v61 = vld [vmem:[#allocation7 + $0x90] ss:$8 sps:$4 sm:$0xff]  }
  0x7f   :  { %391 = vmatprep.subr.bf16.mxu0 %v2852_v12  ;;  %3361 = vst [vmem:[#allocation37_spill] sm:$0xff] %v2988_v61  ;;  %v2990_v62 = vld [vmem:[#allocation6 + $0x100] ss:$8 sps:$4 sm:$0xff]   ;;  %v127_v63 = vpack.c.bf16 %v124_v58, %v121_v57  ;;  %v2992_v13 = vld [vmem:[#allocation6 + $0x114] ss:$8 sps:$4 sm:$0xff]   ;;  %v3319_v57 = vmov 0   ;;  %v2030_v58 = vcombine.high %v2905_v32, %v2911_v34 }
  0x80   :  { %693 = vmatpush1.bf16.msra.mxu1 %v2924_v39  ;;  %v2995_v14 = vld [vmem:[#allocation7 + $0xa4] ss:$8 sps:$4 sm:$0xff]   ;;  %v3000_v15 = vld [vmem:[#allocation7 + $0xa0] ss:$8 sps:$4 sm:$0xff]  }
  0x81   :  { %694 = vmatprep.subr.bf16.mxu1 %v2930_v41  ;;  %3362 = vst [vmem:[#allocation38_spill] sm:$0xff] %v2995_v14  ;;  %3363 = vst [vmem:[#allocation39_spill] sm:$0xff] %v3000_v15  ;;  %v3002_v38 = vld [vmem:[#allocation6 + $0x110] ss:$8 sps:$4 sm:$0xff]  }
  0x82   :  { %392 = vmatpush1.bf16.msra.mxu0 %v2861_v16  ;;  %v3027_v34 = vld [vmem:[#allocation7 + $0xc0] ss:$8 sps:$4 sm:$0xff]  }
  0x83   :  { %393 = vmatprep.subr.bf16.mxu0 %v2864_v17  ;;  %3367 = vst [vmem:[#allocation43_spill] sm:$0xff] %v3027_v34  ;;  %v2427_v27 = vld [vmem:[#allocation10] sm:$0xff]   ;;  %v2432_v25 = vld [vmem:[#allocation10 + $0x58] sm:$0xff]  }
  0x84   :  { %695 = vmatpush1.bf16.msra.mxu1 %v2933_v42 }
  0x85   :  { %696 = vmatprep.subr.bf16.mxu1 %v2937_v44 }
  0x86   :  { %394 = vmatpush1.bf16.msra.mxu0 %v2866_v18 }
  0x87   :  { %395 = vmatprep.subr.bf16.mxu0 %v2868_v19 }
  0x88   :  { %697 = vmatpush1.bf16.msra.mxu1 %v2946_v47 }
  0x89   :  { %698 = vmatprep.subr.bf16.mxu1 %v2950_v49 }
  0x8a   :  { %396 = vmatpush1.bf16.msra.mxu0 %v2883_v24 }
  0x8b   :  { %397 = vmatprep.subr.bf16.mxu0 %v2889_v26 }
  0x8c   :  { %699 = vmatpush1.bf16.msra.mxu1 %v2958_v51 }
  0x8d   :  { %700 = vmatprep.subr.bf16.mxu1 %v2962_v53  ;;  %v3004_v53 = vld [vmem:[#allocation7 + $0xb4] ss:$8 sps:$4 sm:$0xff]  }
  0x8e   :  { %398 = vmatpush1.bf16.msra.mxu0 %v2895_v28  ;;  %3364 = vst [vmem:[#allocation40_spill] sm:$0xff] %v3004_v53 }
  0x8f   :  { %399 = vmatprep.subr.bf16.mxu0 %v2901_v30 }
  0x90   :  { %701 = vmatpush1.bf16.msra.mxu1 %v2970_v55  ;;  %v3021_v55 = vld [vmem:[#allocation7 + $0xc4] ss:$8 sps:$4 sm:$0xff]  }
  0x91   :  { %702 = vmatprep.subr.bf16.mxu1 %v2980_v59  ;;  %v3013_v59 = vld [vmem:[#allocation7 + $0xb0] ss:$8 sps:$4 sm:$0xff]   ;;  %3366 = vst [vmem:[#allocation42_spill] sm:$0xff] %v3021_v55 }
  0x92   :  { %400 = vmatpush1.bf16.msra.mxu0 %v2903_v31  ;;  %3365 = vst [vmem:[#allocation41_spill] sm:$0xff] %v3013_v59 }
  0x93   :  { %401 = vmatprep.subr.bf16.mxu0 %v2917_v36 }
  0x94   :  { %703 = vmatpush1.bf16.msra.mxu1 %v2988_v61  ;;  %v126_v61 = vld [vmem:[%s3303_s1 + $0x28] sm:$0xff] }
  0x95   :  { %704 = vmatprep.subr.bf16.mxu1 %v2995_v14  ;;  %v3033_v14 = vld [vmem:[#allocation7 + $0xd4] ss:$8 sps:$4 sm:$0xff]  }
  0x96   :  { %402 = vmatpush1.bf16.msra.mxu0 %v2919_v37  ;;  %3368 = vst [vmem:[#allocation44_spill] sm:$0xff] %v3033_v14 }
  0x97   :  { %403 = vmatprep.subr.bf16.mxu0 %v2927_v40 }
  0x98   :  { %705 = vmatpush1.bf16.msra.mxu1 %v3000_v15  ;;  %v3035_v15 = vld [vmem:[#allocation7 + $0xd0] ss:$8 sps:$4 sm:$0xff]  }
  0x99   :  { %706 = vmatprep.subr.bf16.mxu1 %v3004_v53  ;;  %3369 = vst [vmem:[#allocation45_spill] sm:$0xff] %v3035_v15 }
  0x9a   :  { %404 = vmatpush1.bf16.msra.mxu0 %v2935_v43 }
  0x9b   :  { %405 = vmatprep.subr.bf16.mxu0 %v2939_v45 }
  0x9c   :  { %707 = vmatpush1.bf16.msra.mxu1 %v3013_v59 }
  0x9d   :  { %708 = vmatprep.subr.bf16.mxu1 %v3021_v55 }
  0x9e   :  { %406 = vmatpush1.bf16.msra.mxu0 %v2948_v48 }
  0x9f   :  { %407 = vmatprep.subr.bf16.mxu0 %v2952_v50 }
  0xa0   :  { %709 = vmatpush1.bf16.msra.mxu1 %v3027_v34 }
  0xa1   :  { %710 = vmatprep.subr.bf16.mxu1 %v3033_v14  ;;  %v170_v14 = vlaneseq }
  0xa2   :  { %408 = vmatpush1.bf16.msra.mxu0 %v2960_v52 }
  0xa3   :  { %409 = vmatprep.subr.bf16.mxu0 %v2964_v54 }
  0xa4   :  { %711 = vmatpush1.bf16.msra.mxu1 %v3035_v15  ;;  %v171_v15 = vshrl.u32 %v170_v14, 7 }
  0xa6   :  { %410 = vmatpush1.bf16.msra.mxu0 %v2972_v56  ;;  %v3051_v34 = vsub.s32 0, %v171_v15 }
  0xa7   :  { %422 = vmatprep.subr.bf16.mxu0 %v2982_v60 }
  0xa9   :  { %412 = vmatmul.mubr.bf16.vlgmr.msra.gmra.mrb[0].mxu0 %v127_v63  ;;  %v123_v63 = vld [vmem:[%s3303_s1 + $0x10] sm:$0xff]  ;;  %s118_s1 = sld [smem:[#allocation2]] }
  0xaa   :  { %423 = vmatpush1.bf16.msra.mxu0 %v2990_v62  ;;  %454 = vmatprep.mubr.bf16.mxu0 %v3319_v57  ;;  %v129_v57 = vpack.c.bf16 %v126_v61, %v123_v63  ;;  %v3041_v61 = vld [vmem:[#allocation7 + $0xe0] ss:$8 sps:$4 sm:$0xff]  }
  0xab   :  { %424 = vmatprep.subr.bf16.mxu0 %v2992_v13  ;;  %3371 = vst [vmem:[#allocation47_spill] sm:$0xff] %v3041_v61  ;;  %v2426_v63 = vld [vmem:[#allocation10 + $0x40] sm:$0xff]  }
  0xae   :  { %425 = vmatpush1.bf16.msra.mxu0 %v3002_v38 }
  0xaf   :  { %2031 = vmatprep.subr.msk.bf16.mxu0 %vm372_vm0, %v2030_v58  ;;  %v3039_v58 = vld [vmem:[#allocation7 + $0xe4] ss:$8 sps:$4 sm:$0xff]   ;;  %v3060_v53 = vstv %s118_s1 }
  0xb0   :  { %3370 = vst [vmem:[#allocation46_spill] sm:$0xff] %v3039_v58  ;;  %712 = vmatprep.subr.bf16.mxu1 %v3039_v58  ;;  %v168_v58 = vld [vmem:[%s3306_s4] sm:$0x3]  ;;  %3374 = vst [vmem:[#allocation50_spill] sm:$0xff] %v3060_v53 }
  0xb1   :  { %713 = vmatpush1.bf16.msra.mxu1 %v3041_v61  ;;  %v3056_v61 = vsub.s32 1, %v171_v15  ;;  %v173_v55 = vrot.slane %v168_v58, %v3051_v34 }
  0xb2   :  { %427 = vmatpush1.bf16.msra.mxu0 %v374_v46  ;;  %v3045_v46 = vld [vmem:[#allocation7 + $0xf4] ss:$8 sps:$4 sm:$0xff]  }
  0xb3   :  { %3372 = vst [vmem:[#allocation48_spill] sm:$0xff] %v3045_v46  ;;  %714 = vmatprep.subr.bf16.mxu1 %v3045_v46  ;;  %v177_v59 = vrot.slane %v168_v58, %v3056_v61 }
  0xb5   :  { %2032 = vmatmul.mubr.msk.bf16.vlgmr.msra.gmra.mrb[0].mxu0 %vm368_vm1, %v129_v57  ;;  %v3047_v57 = vld [vmem:[#allocation7 + $0xf0] ss:$8 sps:$4 sm:$0xff]  }
  0xb6   :  { %3373 = vst [vmem:[#allocation49_spill] sm:$0xff] %v3047_v57  ;;  %715 = vmatpush1.bf16.msra.mxu1 %v3047_v57 }
  0xb7   :  { %2189 = vmatprep.subr.bf16.mxu1 %v2426_v63 }
 0x188   :  { %v456_v46 = vpop.f32.mrb[0].mxu0 }
 0x189   :  { %v2291_v57 = vadd.f32 %v456_v46, %v173_v55  ;;  %v458_v63 = vpop.f32.mrb[1].mxu0 }
 0x18a   :  { %v2292_v51 = vadd.f32 %v458_v63, %v177_v59  ;;  %v460_v14 = vpop.f32.mrb[2].mxu0 }
 0x18b   :  { %v470_v49 = vmul.f32 %v2291_v57, %v3060_v53  ;;  %v2293_v47 = vadd.f32 %v460_v14, %v173_v55  ;;  %v462_v44 = vpop.f32.mrb[3].mxu0  ;;  %vm465_vm2 = vcmp.gt.f32.partialorder %v2291_v57, 0.0  ;;  %v2428_v55 = vld [vmem:[#allocation10 + $0x48] sm:$0xff]  }
 0x18c   :  { %v471_v42 = vmul.f32 %v2292_v51, %v3060_v53  ;;  %v2294_v15 = vadd.f32 %v462_v44, %v177_v59  ;;  %vm466_vm4 = vcmp.gt.f32.partialorder %v2292_v51, 0.0  ;;  %v2429_v14 = vld [vmem:[#allocation10 + $0x8] sm:$0xff]   ;;  %v2430_v44 = vld [vmem:[#allocation10 + $0x50] sm:$0xff]  }
 0x18d   :  { %vm467_vm3 = vcmp.gt.f32.partialorder %v2293_v47, 0.0  ;;  %v472_v41 = vmul.f32 %v2293_v47, %v3060_v53  ;;  %v474_v39 = vsel %vm465_vm2, %v2291_v57, %v470_v49  ;;  %v2431_v59 = vld [vmem:[#allocation10 + $0x10] sm:$0xff]   ;;  %v2663_v49 = vmov 0.0  }
 0x18e   :  { %v473_v58 = vmul.f32 %v2294_v15, %v3060_v53  ;;  %vm468_vm5 = vcmp.gt.f32.partialorder %v2294_v15, 0.0  ;;  %v475_v35 = vsel %vm466_vm4, %v2292_v51, %v471_v42  ;;  %v2433_v53 = vld [vmem:[#allocation10 + $0x18] sm:$0xff]   ;;  %v2435_v42 = vld [vmem:[#allocation10 + $0x20] sm:$0xff]   ;;  %2251 = vmatprep.subr.bf16.mxu0 %v2663_v49  ;;  %v2448_v57 = vld [vmem:[%s3311_s9 + $0x20] sm:$0xff]   ;;  %2267 = vmatprep.mubr.msk.bf16.mxu0 %vm2664_vm10, %v2663_v49 }
 0x18f   :  { %v476_v46 = vsel %vm467_vm3, %v2293_v47, %v472_v41  ;;  %v2434_v41 = vld [vmem:[#allocation10 + $0x60] sm:$0xff]   ;;  %v2441_v47 = vld [vmem:[#allocation10 + $0x38] sm:$0xff]  }
 0x190   :  { %v477_v63 = vsel %vm468_vm5, %v2294_v15, %v473_v58  ;;  %v478_v33 = vpack.c.bf16 %v476_v46, %v474_v39  ;;  %v2440_v39 = vld [vmem:[#allocation10 + $0x78] sm:$0xff]  }
 0x191   :  { %v479_v29 = vpack.c.bf16 %v477_v63, %v475_v35  ;;  %v2436_v35 = vld [vmem:[#allocation10 + $0x68] sm:$0xff]   ;;  %v2445_v51 = vld [vmem:[%s3311_s9 + $0x8] sm:$0xff]   ;;  %v512_v15 = vld [vmem:[#allocation9] sm:$0x3] }
 0x192   :  { %v517_v58 = vrot.slane %v512_v15, %v3051_v34  ;;  %v521_v46 = vrot.slane %v512_v15, %v3056_v61 }
 0x193   :  { %716 = vmatprep.mubr.bf16.mxu1 %v479_v29  ;;  %v2437_v29 = vld [vmem:[#allocation10 + $0x28] sm:$0xff]  }
 0x194   :  { %717 = vmatmul.mubr.bf16.vlgmr.msra.gmra.mrb[0].mxu1 %v478_v33  ;;  %v2439_v33 = vld [vmem:[#allocation10 + $0x30] sm:$0xff]  }
 0x195   :  { %2190 = vmatpush3.bf16.msra.mxu1 %v2427_v27  ;;  %v2438_v27 = vld [vmem:[#allocation10 + $0x70] sm:$0xff]  }
 0x196   :  { %2191 = vmatprep.subr.bf16.mxu1 %v2428_v55  ;;  %v3090_v55 = vstv %s1991_s25 }
 0x199   :  { %2192 = vmatpush3.bf16.msra.mxu1 %v2429_v14 }
 0x19a   :  { %2193 = vmatprep.subr.bf16.mxu1 %v2430_v44 }
 0x19d   :  { %2194 = vmatpush3.bf16.msra.mxu1 %v2431_v59 }
 0x19e   :  { %2195 = vmatprep.subr.bf16.mxu1 %v2432_v25  ;;  %v2444_v25 = vld [vmem:[%s3311_s9] sm:$0xff]  }
 0x19f   :  { %2252 = vmatpush3.bf16.msra.mxu0 %v2444_v25  ;;  %v1042_v25 = vld [vmem:[%s3304_s2 + $0x8] sm:$0xff] }
 0x1a0   :  { %2253 = vmatprep.subr.bf16.mxu0 %v2663_v49 }
 0x1a1   :  { %2196 = vmatpush3.bf16.msra.mxu1 %v2433_v53  ;;  %v2446_v53 = vld [vmem:[%s3311_s9 + $0x10] sm:$0xff]  }
 0x1a2   :  { %2197 = vmatprep.subr.bf16.mxu1 %v2434_v41 }
 0x1a3   :  { %2254 = vmatpush3.bf16.msra.mxu0 %v2445_v51  ;;  %v1045_v51 = vld [vmem:[%s3304_s2 + $0x20] sm:$0xff] }
 0x1a4   :  { %2255 = vmatprep.subr.bf16.mxu0 %v2663_v49 }
 0x1a5   :  { %2198 = vmatpush3.bf16.msra.mxu1 %v2435_v42 }
 0x1a6   :  { %2199 = vmatprep.subr.bf16.mxu1 %v2436_v35 }
 0x1a7   :  { %2256 = vmatpush3.bf16.msra.mxu0 %v2446_v53 }
 0x1a8   :  { %2257 = vmatprep.subr.bf16.mxu0 %v2663_v49 }
 0x1a9   :  { %2200 = vmatpush3.bf16.msra.mxu1 %v2437_v29 }
 0x1aa   :  { %2201 = vmatprep.subr.bf16.mxu1 %v2438_v27 }
 0x1ad   :  { %2202 = vmatpush3.bf16.msra.mxu1 %v2439_v33 }
 0x1ae   :  { %2203 = vmatprep.subr.bf16.mxu1 %v2440_v39 }
 0x1b1   :  { %2204 = vmatpush3.bf16.msra.mxu1 %v2441_v47 }
 0x1b2   :  { %1297 = vmatprep.subr.bf16.mxu1 %v2817_v0  ;;  %v2447_v0 = vld [vmem:[%s3311_s9 + $0x18] sm:$0xff]  }
 0x1b3   :  { %2258 = vmatpush3.bf16.msra.mxu0 %v2447_v0 }
 0x1b4   :  { %2259 = vmatprep.subr.bf16.mxu0 %v2663_v49 }
 0x1b7   :  { %2260 = vmatpush3.bf16.msra.mxu0 %v2448_v57 }
 0x1b8   :  { %2261 = vmatprep.subr.bf16.mxu0 %v2663_v49 }
 0x267   :  { %v718_v63 = vpop.f32.mrb[0].mxu1 }
 0x268   :  { %v719_v14 = vadd.f32 %v718_v63, %v517_v58  ;;  %v720_v44 = vpop.f32.mrb[1].mxu1  ;;  %v1048_v63 = vpack.c.bf16 %v1045_v51, %v1042_v25  ;;  %v3398_v25 = vld [vmem:[#allocation44_spill] sm:$0xff]  ;;  %v3399_v51 = vld [vmem:[#allocation45_spill] sm:$0xff] }
 0x269   :  { %v721_v59 = vadd.f32 %v720_v44, %v521_v46  ;;  %v722_v41 = vpop.f32.mrb[2].mxu1  ;;  %v3388_v44 = vld [vmem:[#allocation34_spill] sm:$0xff] }
 0x26a   :  { %v732_v42 = vmul.f32 %v3090_v55, %v719_v14  ;;  %v723_v35 = vadd.f32 %v722_v41, %v517_v58  ;;  %v724_v29 = vpop.f32.mrb[3].mxu1  ;;  %vm727_vm6 = vcmp.gt.f32.partialorder %v719_v14, 0.0  ;;  %v3390_v41 = vld [vmem:[#allocation36_spill] sm:$0xff] }
 0x26b   :  { %v733_v27 = vmul.f32 %v3090_v55, %v721_v59  ;;  %v725_v33 = vadd.f32 %v724_v29, %v521_v46  ;;  %vm728_vm7 = vcmp.gt.f32.partialorder %v721_v59, 0.0  ;;  %v3393_v29 = vld [vmem:[#allocation39_spill] sm:$0xff] }
 0x26c   :  { %vm729_vm8 = vcmp.gt.f32.partialorder %v723_v35, 0.0  ;;  %v734_v39 = vmul.f32 %v3090_v55, %v723_v35  ;;  %v736_v53 = vsel %vm727_vm6, %v719_v14, %v732_v42  ;;  %v3387_v14 = vld [vmem:[#allocation33_spill] sm:$0xff] }
 0x26d   :  { %vm730_vm9 = vcmp.gt.f32.partialorder %v725_v33, 0.0  ;;  %v735_v47 = vmul.f32 %v3090_v55, %v725_v33  ;;  %v737_v15 = vsel %vm728_vm7, %v721_v59, %v733_v27  ;;  %v3389_v59 = vld [vmem:[#allocation35_spill] sm:$0xff]  ;;  %v3391_v42 = vld [vmem:[#allocation37_spill] sm:$0xff]  ;;  %v3394_v27 = vld [vmem:[#allocation40_spill] sm:$0xff] }
 0x26e   :  { %v738_v0 = vsel %vm729_vm8, %v723_v35, %v734_v39  ;;  %v3392_v35 = vld [vmem:[#allocation38_spill] sm:$0xff] }
 0x26f   :  { %v740_v57 = vpack.c.bf16 %v738_v0, %v736_v53  ;;  %v739_v58 = vsel %vm730_vm9, %v725_v33, %v735_v47  ;;  %v3395_v33 = vld [vmem:[#allocation41_spill] sm:$0xff]  ;;  %v3396_v39 = vld [vmem:[#allocation42_spill] sm:$0xff]  ;;  %v3397_v47 = vld [vmem:[#allocation43_spill] sm:$0xff] }
 0x270   :  { %v741_v46 = vpack.c.bf16 %v739_v58, %v737_v15  ;;  %v3400_v53 = vld [vmem:[#allocation46_spill] sm:$0xff]  ;;  %v1088_v0 = vld [vmem:[%s3306_s4] sm:$0x3]  ;;  %v3402_v15 = vld [vmem:[#allocation48_spill] sm:$0xff] }
 0x271   :  { %v1093_v58 = vrot.slane %v1088_v0, %v3051_v34 }
 0x272   :  { %909 = vmatprep.mubr.bf16.mxu1 %v741_v46  ;;  %v1097_v46 = vrot.slane %v1088_v0, %v3056_v61 }
 0x273   :  { %910 = vmatmul.mubr.bf16.vlgmr.msra.gmra.mrb[4].mxu1 %v740_v57  ;;  %v3401_v57 = vld [vmem:[#allocation47_spill] sm:$0xff] }
 0x274   :  { %1298 = vmatpush1.bf16.msra.mxu1 %v2819_v1  ;;  %1329 = vmatprep.mubr.bf16.mxu1 %v1048_v63  ;;  %v1041_v1 = vld [vmem:[%s3304_s2] sm:$0xff]  ;;  %v3403_v63 = vld [vmem:[#allocation49_spill] sm:$0xff] }
 0x275   :  { %1299 = vmatprep.subr.bf16.mxu1 %v2822_v2  ;;  %v1044_v2 = vld [vmem:[%s3304_s2 + $0x18] sm:$0xff] }
 0x278   :  { %1300 = vmatpush1.bf16.msra.mxu1 %v2825_v3  ;;  %v1047_v3 = vpack.c.bf16 %v1044_v2, %v1041_v1 }
 0x279   :  { %1301 = vmatprep.subr.bf16.mxu1 %v2828_v4  ;;  %v1087_v4 = vld [vmem:[#allocation6 + $0x128] sm:$0x33] }
 0x27c   :  { %1302 = vmatpush1.bf16.msra.mxu1 %v2831_v5  ;;  %v3375_v5 = vmov 0  }
 0x27d   :  { %1303 = vmatprep.subr.bf16.mxu1 %v2834_v6  ;;  %v2128_v6 = vcombine.high %v2905_v32, %v1087_v4 }
 0x280   :  { %1304 = vmatpush1.bf16.msra.mxu1 %v2837_v7  ;;  %v2127_v7 = vcombine.low %v2905_v32, %v1087_v4 }
 0x281   :  { %1305 = vmatprep.subr.bf16.mxu1 %v2840_v8  ;;  %v1043_v8 = vld [vmem:[%s3304_s2 + $0x10] sm:$0xff] }
 0x284   :  { %1306 = vmatpush1.bf16.msra.mxu1 %v2843_v9  ;;  %v1046_v9 = vld [vmem:[%s3304_s2 + $0x28] sm:$0xff] }
 0x285   :  { %1307 = vmatprep.subr.bf16.mxu1 %v2846_v10  ;;  %v1292_v10 = vsel %vm372_vm0, %v2127_v7, 0 }
 0x288   :  { %1308 = vmatpush1.bf16.msra.mxu1 %v2849_v11  ;;  %v1049_v11 = vpack.c.bf16 %v1046_v9, %v1043_v8 }
 0x289   :  { %1309 = vmatprep.subr.bf16.mxu1 %v2852_v12  ;;  %v2449_v12 = vld [vmem:[%s3311_s9 + $0x28] sm:$0xff]  }
 0x28a   :  { %2262 = vmatpush3.bf16.msra.mxu0 %v2449_v12 }
 0x28b   :  { %2263 = vmatprep.subr.bf16.mxu0 %v2663_v49 }
 0x28c   :  { %1310 = vmatpush1.bf16.msra.mxu1 %v2861_v16  ;;  %v2450_v16 = vld [vmem:[%s3311_s9 + $0x30] sm:$0xff]  }
 0x28d   :  { %1311 = vmatprep.subr.bf16.mxu1 %v2864_v17  ;;  %v2451_v17 = vld [vmem:[%s3311_s9 + $0x38] sm:$0xff]  }
 0x28e   :  { %2264 = vmatpush3.bf16.msra.mxu0 %v2450_v16 }
 0x28f   :  { %2265 = vmatprep.subr.bf16.mxu0 %v2663_v49 }
 0x290   :  { %1312 = vmatpush1.bf16.msra.mxu1 %v2866_v18 }
 0x291   :  { %1313 = vmatprep.subr.bf16.mxu1 %v2868_v19  ;;  %v3170_v19 = vld [vmem:[#allocation12] ss:$0 sm:$0xff] }
 0x292   :  { %2266 = vmatpush3.bf16.msra.mxu0 %v2451_v17 }
 0x293   :  { %1601 = vmatprep.subr.bf16.mxu0 %v2871_v20 }
 0x294   :  { %1314 = vmatpush1.bf16.msra.mxu1 %v2883_v24 }
 0x295   :  { %1315 = vmatprep.subr.bf16.mxu1 %v2889_v26 }
 0x298   :  { %1316 = vmatpush1.bf16.msra.mxu1 %v2895_v28 }
 0x299   :  { %1317 = vmatprep.subr.bf16.mxu1 %v2901_v30  ;;  %v3172_v30 = vstv %s1992_s6 }
 0x29c   :  { %1318 = vmatpush1.bf16.msra.mxu1 %v2903_v31 }
 0x29d   :  { %1319 = vmatprep.subr.bf16.mxu1 %v2917_v36 }
 0x2a0   :  { %1320 = vmatpush1.bf16.msra.mxu1 %v2919_v37 }
 0x2a1   :  { %1321 = vmatprep.subr.bf16.mxu1 %v2927_v40 }
 0x2a4   :  { %1322 = vmatpush1.bf16.msra.mxu1 %v2935_v43 }
 0x2a5   :  { %1323 = vmatprep.subr.bf16.mxu1 %v2939_v45 }
 0x2a8   :  { %1324 = vmatpush1.bf16.msra.mxu1 %v2948_v48 }
 0x2a9   :  { %1325 = vmatprep.subr.bf16.mxu1 %v2952_v50  ;;  %v3376_v50 = vld [vmem:[#allocation22_spill] sm:$0xff] }
 0x2ac   :  { %1326 = vmatpush1.bf16.msra.mxu1 %v2960_v52  ;;  %v3377_v52 = vld [vmem:[#allocation23_spill] sm:$0xff] }
 0x2ad   :  { %1327 = vmatprep.subr.bf16.mxu1 %v2964_v54  ;;  %v3378_v54 = vld [vmem:[#allocation24_spill] sm:$0xff] }
 0x2b0   :  { %1328 = vmatpush1.bf16.msra.mxu1 %v2972_v56  ;;  %v3379_v56 = vld [vmem:[#allocation25_spill] sm:$0xff] }
 0x2b1   :  { %1340 = vmatprep.subr.bf16.mxu1 %v2982_v60  ;;  %v3380_v60 = vld [vmem:[#allocation26_spill] sm:$0xff] }
 0x2b3   :  { %1330 = vmatmul.mubr.bf16.vlgmr.msra.gmra.mrb[8].mxu1 %v1047_v3 }
 0x2b4   :  { %1341 = vmatpush1.bf16.msra.mxu1 %v2990_v62  ;;  %1372 = vmatprep.mubr.bf16.mxu1 %v3375_v5  ;;  %v3381_v62 = vld [vmem:[#allocation27_spill] sm:$0xff] }
 0x2b5   :  { %1342 = vmatprep.subr.bf16.mxu1 %v2992_v13  ;;  %v3382_v13 = vld [vmem:[#allocation28_spill] sm:$0xff] }
 0x2b8   :  { %1343 = vmatpush1.bf16.msra.mxu1 %v3002_v38  ;;  %v3383_v38 = vld [vmem:[#allocation29_spill] sm:$0xff] }
 0x2b9   :  { %2129 = vmatprep.subr.msk.bf16.mxu1 %vm372_vm0, %v2128_v6  ;;  %v3404_v6 = vld [vmem:[#allocation50_spill] sm:$0xff] }
 0x2bc   :  { %1345 = vmatpush1.bf16.msra.mxu1 %v1292_v10 }
 0x2bd   :  { %2271 = vmatprep.subr.bf16.mxu1 %v2663_v49 }
 0x2bf   :  { %2130 = vmatmul.mubr.msk.bf16.vlgmr.msra.gmra.mrb[8].mxu1 %vm368_vm1, %v1049_v11  ;;  %vm1038_vm1 = vcmask 523264  }
 0x2c0   :  { %2287 = vmatprep.mubr.msk.bf16.mxu1 %vm2664_vm10, %v2663_v49 }
 0x346   :  { %v2205_v18 = vpop.f32.mrb[4].mxu1 }
 0x347   :  { %v2206_v24 = vpop.f32.mrb[5].mxu1 }
 0x348   :  { %v2207_v26 = vadd.f32 %v2206_v24, %v2205_v18  ;;  %v2208_v28 = vpop.f32.mrb[6].mxu1 }
 0x349   :  { %v2209_v31 = vpop.f32.mrb[7].mxu1 }
 0x34a   :  { %v912_v32 = vadd.f32 %v2207_v26, %v3170_v19  ;;  %v2210_v36 = vadd.f32 %v2209_v31, %v2208_v28 }
 0x34c   :  { %v921_v37 = vmul.f32 %v3172_v30, %v912_v32  ;;  %v915_v40 = vadd.f32 %v2210_v36, %v3170_v19  ;;  %vm918_vm11 = vcmp.gt.f32.partialorder %v912_v32, 0.0  ;;  %v2453_v36 = vld [vmem:[#allocation10] sm:$0xff]  }
 0x34e   :  { %vm919_vm12 = vcmp.gt.f32.partialorder %v915_v40, 0.0  ;;  %v922_v20 = vmul.f32 %v3172_v30, %v915_v40  ;;  %v923_v43 = vsel %vm918_vm11, %v912_v32, %v921_v37  ;;  %v2452_v32 = vld [vmem:[#allocation10 + $0x40] sm:$0xff]   ;;  %v2454_v37 = vld [vmem:[#allocation10 + $0x48] sm:$0xff]  }
 0x350   :  { %v924_v45 = vsel %vm919_vm12, %v915_v40, %v922_v20  ;;  %v2455_v40 = vld [vmem:[#allocation10 + $0x8] sm:$0xff]   ;;  %v2456_v20 = vld [vmem:[#allocation10 + $0x50] sm:$0xff]  }
 0x351   :  { %v925_v48 = vpack.c.bf16 %v924_v45, %v923_v43  ;;  %v2457_v43 = vld [vmem:[#allocation10 + $0x10] sm:$0xff]   ;;  %v2458_v45 = vld [vmem:[#allocation10 + $0x58] sm:$0xff]  }
 0x353   :  { %2268 = vmatmul.mubr.bf16.vlgmr.msra.gmra.mrb[4].mxu0 %v925_v48  ;;  %v2459_v48 = vld [vmem:[#allocation10 + $0x18] sm:$0xff]  }
 0x354   :  { %1602 = vmatpush1.bf16.msra.mxu0 %v2873_v21  ;;  %v3384_v21 = vld [vmem:[#allocation30_spill] sm:$0xff] }
 0x355   :  { %1603 = vmatprep.subr.bf16.mxu0 %v2876_v22  ;;  %v3385_v22 = vld [vmem:[#allocation31_spill] sm:$0xff] }
 0x358   :  { %1604 = vmatpush1.bf16.msra.mxu0 %v2880_v23  ;;  %v3386_v23 = vld [vmem:[#allocation32_spill] sm:$0xff] }
 0x359   :  { %1605 = vmatprep.subr.bf16.mxu0 %v3376_v50  ;;  %v2460_v50 = vld [vmem:[#allocation10 + $0x60] sm:$0xff]  }
 0x35c   :  { %1606 = vmatpush1.bf16.msra.mxu0 %v3377_v52  ;;  %v2461_v52 = vld [vmem:[#allocation10 + $0x20] sm:$0xff]  }
 0x35d   :  { %1607 = vmatprep.subr.bf16.mxu0 %v3378_v54  ;;  %v2462_v54 = vld [vmem:[#allocation10 + $0x68] sm:$0xff]  }
 0x360   :  { %1608 = vmatpush1.bf16.msra.mxu0 %v3379_v56  ;;  %v2463_v56 = vld [vmem:[#allocation10 + $0x28] sm:$0xff]  }
 0x361   :  { %1609 = vmatprep.subr.bf16.mxu0 %v3380_v60  ;;  %v2464_v60 = vld [vmem:[#allocation10 + $0x70] sm:$0xff]  }
 0x364   :  { %1610 = vmatpush1.bf16.msra.mxu0 %v3381_v62  ;;  %v2465_v62 = vld [vmem:[#allocation10 + $0x30] sm:$0xff]  }
 0x365   :  { %1611 = vmatprep.subr.bf16.mxu0 %v3382_v13  ;;  %v2466_v13 = vld [vmem:[#allocation10 + $0x78] sm:$0xff]  }
 0x368   :  { %1612 = vmatpush1.bf16.msra.mxu0 %v3383_v38  ;;  %v2467_v38 = vld [vmem:[#allocation10 + $0x38] sm:$0xff]  }
 0x369   :  { %1613 = vmatprep.subr.bf16.mxu0 %v3384_v21  ;;  %v2468_v21 = vld [vmem:[%s3311_s9] sm:$0xff]  }
 0x36a   :  { %2272 = vmatpush3.bf16.msra.mxu1 %v2468_v21 }
 0x36b   :  { %2273 = vmatprep.subr.bf16.mxu1 %v2663_v49 }
 0x36c   :  { %1614 = vmatpush1.bf16.msra.mxu0 %v3385_v22  ;;  %v2469_v22 = vld [vmem:[%s3311_s9 + $0x8] sm:$0xff]  }
 0x36d   :  { %1615 = vmatprep.subr.bf16.mxu0 %v3386_v23  ;;  %v2470_v23 = vld [vmem:[%s3311_s9 + $0x10] sm:$0xff]  }
 0x36e   :  { %2274 = vmatpush3.bf16.msra.mxu1 %v2469_v22 }
 0x36f   :  { %2275 = vmatprep.subr.bf16.mxu1 %v2663_v49 }
 0x370   :  { %1616 = vmatpush1.bf16.msra.mxu0 %v3387_v14  ;;  %v2471_v14 = vld [vmem:[%s3311_s9 + $0x18] sm:$0xff]  }
 0x371   :  { %1617 = vmatprep.subr.bf16.mxu0 %v3388_v44  ;;  %v2472_v44 = vld [vmem:[%s3311_s9 + $0x20] sm:$0xff]  }
 0x372   :  { %2276 = vmatpush3.bf16.msra.mxu1 %v2470_v23 }
 0x373   :  { %2277 = vmatprep.subr.bf16.mxu1 %v2663_v49 }
 0x374   :  { %1618 = vmatpush1.bf16.msra.mxu0 %v3389_v59  ;;  %v3241_v59 = vld [vmem:[%s3312_s10] ss:$0 sm:$0xff] }
 0x375   :  { %1619 = vmatprep.subr.bf16.mxu0 %v3390_v41 }
 0x376   :  { %2278 = vmatpush3.bf16.msra.mxu1 %v2471_v14 }
 0x377   :  { %2279 = vmatprep.subr.bf16.mxu1 %v2663_v49 }
 0x378   :  { %1620 = vmatpush1.bf16.msra.mxu0 %v3391_v42 }
 0x379   :  { %1621 = vmatprep.subr.bf16.mxu0 %v3392_v35 }
 0x37a   :  { %2280 = vmatpush3.bf16.msra.mxu1 %v2472_v44 }
 0x37b   :  { %2281 = vmatprep.subr.bf16.mxu1 %v2663_v49 }
 0x37c   :  { %1622 = vmatpush1.bf16.msra.mxu0 %v3393_v29 }
 0x37d   :  { %1623 = vmatprep.subr.bf16.mxu0 %v3394_v27 }
 0x380   :  { %1624 = vmatpush1.bf16.msra.mxu0 %v3395_v33 }
 0x381   :  { %1625 = vmatprep.subr.bf16.mxu0 %v3396_v39  ;;  %v1429_v39 = vld [vmem:[#allocation9] sm:$0x3] }
 0x384   :  { %1626 = vmatpush1.bf16.msra.mxu0 %v3397_v47  ;;  %v1434_v47 = vrot.slane %v1429_v39, %v3051_v34 }
 0x385   :  { %1627 = vmatprep.subr.bf16.mxu0 %v3398_v25  ;;  %v1438_v25 = vrot.slane %v1429_v39, %v3056_v61 }
 0x388   :  { %1628 = vmatpush1.bf16.msra.mxu0 %v3399_v51 }
 0x389   :  { %1629 = vmatprep.subr.bf16.mxu0 %v3400_v53 }
 0x38c   :  { %1630 = vmatpush1.bf16.msra.mxu0 %v3401_v57 }
 0x38d   :  { %1631 = vmatprep.subr.bf16.mxu0 %v3402_v15 }
 0x390   :  { %1632 = vmatpush1.bf16.msra.mxu0 %v3403_v63 }
 0x391   :  { %2220 = vmatprep.subr.bf16.mxu0 %v2452_v32 }
 0x392   :  { %v1374_v1 = vpop.f32.mrb[8].mxu1 }
 0x393   :  { %v2295_v2 = vadd.f32 %v1374_v1, %v1093_v58  ;;  %v1376_v3 = vpop.f32.mrb[9].mxu1 }
 0x394   :  { %v2296_v4 = vadd.f32 %v1376_v3, %v1097_v46  ;;  %v1378_v5 = vpop.f32.mrb[10].mxu1 }
 0x395   :  { %v1387_v7 = vmul.f32 %v2295_v2, %v3404_v6  ;;  %v2297_v8 = vadd.f32 %v1378_v5, %v1093_v58  ;;  %v1380_v9 = vpop.f32.mrb[11].mxu1  ;;  %vm1383_vm13 = vcmp.gt.f32.partialorder %v2295_v2, 0.0 }
 0x396   :  { %v1388_v10 = vmul.f32 %v2296_v4, %v3404_v6  ;;  %v2298_v11 = vadd.f32 %v1380_v9, %v1097_v46  ;;  %vm1384_vm14 = vcmp.gt.f32.partialorder %v2296_v4, 0.0  ;;  %v2473_v9 = vld [vmem:[%s3311_s9 + $0x28] sm:$0xff]  }
 0x397   :  { %vm1385_vm15 = vcmp.gt.f32.partialorder %v2297_v8, 0.0  ;;  %v1389_v12 = vmul.f32 %v2297_v8, %v3404_v6  ;;  %v1391_v17 = vsel %vm1383_vm13, %v2295_v2, %v1387_v7  ;;  %2282 = vmatpush3.bf16.msra.mxu1 %v2473_v9 }
 0x398   :  { %vm1386_vm0 = vcmp.gt.f32.partialorder %v2298_v11, 0.0  ;;  %v1390_v16 = vmul.f32 %v2298_v11, %v3404_v6  ;;  %v1392_v26 = vsel %vm1384_vm14, %v2296_v4, %v1388_v10  ;;  %2283 = vmatprep.subr.bf16.mxu1 %v2663_v49  ;;  %v2474_v10 = vld [vmem:[%s3311_s9 + $0x30] sm:$0xff]  }
 0x399   :  { %v1393_v18 = vsel %vm1385_vm15, %v2297_v8, %v1389_v12 }
 0x39a   :  { %v1395_v24 = vpack.c.bf16 %v1393_v18, %v1391_v17  ;;  %v1394_v28 = vsel %vm1386_vm0, %v2298_v11, %v1390_v16 }
 0x39b   :  { %v1396_v31 = vpack.c.bf16 %v1394_v28, %v1392_v26  ;;  %2284 = vmatpush3.bf16.msra.mxu1 %v2474_v10 }
 0x39c   :  { %2285 = vmatprep.subr.bf16.mxu1 %v2663_v49 }
 0x39d   :  { %1633 = vmatprep.mubr.bf16.mxu0 %v1396_v31 }
 0x39e   :  { %1634 = vmatmul.mubr.bf16.vlgmr.msra.gmra.mrb[8].mxu0 %v1395_v24 }
 0x39f   :  { %2221 = vmatpush3.bf16.msra.mxu0 %v2453_v36 }
 0x3a0   :  { %2222 = vmatprep.subr.bf16.mxu0 %v2454_v37 }
 0x3a3   :  { %2223 = vmatpush3.bf16.msra.mxu0 %v2455_v40 }
 0x3a4   :  { %2224 = vmatprep.subr.bf16.mxu0 %v2456_v20 }
 0x3a7   :  { %2225 = vmatpush3.bf16.msra.mxu0 %v2457_v43 }
 0x3a8   :  { %2226 = vmatprep.subr.bf16.mxu0 %v2458_v45 }
 0x3ab   :  { %2227 = vmatpush3.bf16.msra.mxu0 %v2459_v48 }
 0x3ac   :  { %2228 = vmatprep.subr.bf16.mxu0 %v2460_v50 }
 0x3af   :  { %2229 = vmatpush3.bf16.msra.mxu0 %v2461_v52 }
 0x3b0   :  { %2230 = vmatprep.subr.bf16.mxu0 %v2462_v54 }
 0x3b3   :  { %2231 = vmatpush3.bf16.msra.mxu0 %v2463_v56 }
 0x3b4   :  { %2232 = vmatprep.subr.bf16.mxu0 %v2464_v60 }
 0x3b7   :  { %2233 = vmatpush3.bf16.msra.mxu0 %v2465_v62 }
 0x3b8   :  { %2234 = vmatprep.subr.bf16.mxu0 %v2466_v13 }
 0x3bb   :  { %2235 = vmatpush3.bf16.msra.mxu0 %v2467_v38 }
 0x426   :  { %v1031_v41 = vpop.f32.mrb[4].mxu0 }
 0x427   :  { %v1032_v42 = vadd.f32 %v3241_v59, %v1031_v41  ;;  %v2269_v35 = vpop.f32.mrb[5].mxu0 }
 0x428   :  { %v1034_v29 = vpop.f32.mrb[6].mxu0 }
 0x429   :  { %v1035_v27 = vadd.f32 %v3241_v59, %v1034_v29  ;;  %v2270_v33 = vpop.f32.mrb[7].mxu0  ;;  %1039 = vst.msk [vmem:[#allocation13] sm:$0xff] %vm1038_vm1, %v1032_v42 }
 0x42b   :  { %1040 = vst.msk [vmem:[#allocation13 + $0x8] sm:$0xff] %vm1038_vm1, %v1035_v27 }
 0x471   :  { %v1635_v51 = vpop.f32.mrb[8].mxu0 }
 0x472   :  { %v1636_v53 = vadd.f32 %v1635_v51, %v1434_v47  ;;  %v1637_v0 = vpop.f32.mrb[9].mxu0 }
 0x473   :  { %v1638_v57 = vadd.f32 %v1637_v0, %v1438_v25  ;;  %v1639_v15 = vpop.f32.mrb[10].mxu0 }
 0x474   :  { %v1648_v58 = vmul.f32 %v1636_v53, %v3090_v55  ;;  %v1640_v46 = vadd.f32 %v1639_v15, %v1434_v47  ;;  %v1641_v63 = vpop.f32.mrb[11].mxu0  ;;  %vm1644_vm2 = vcmp.gt.f32.partialorder %v1636_v53, 0.0 }
 0x475   :  { %v1649_v1 = vmul.f32 %v1638_v57, %v3090_v55  ;;  %v1642_v2 = vadd.f32 %v1641_v63, %v1438_v25  ;;  %vm1645_vm3 = vcmp.gt.f32.partialorder %v1638_v57, 0.0 }
 0x476   :  { %vm1646_vm4 = vcmp.gt.f32.partialorder %v1640_v46, 0.0  ;;  %v1650_v3 = vmul.f32 %v1640_v46, %v3090_v55  ;;  %v1652_v61 = vsel %vm1644_vm2, %v1636_v53, %v1648_v58 }
 0x477   :  { %vm1647_vm5 = vcmp.gt.f32.partialorder %v1642_v2, 0.0  ;;  %v1651_v34 = vmul.f32 %v1642_v2, %v3090_v55  ;;  %v1653_v6 = vsel %vm1645_vm3, %v1638_v57, %v1649_v1  ;;  %v2475_v55 = vld [vmem:[%s3311_s9 + $0x38] sm:$0xff]   ;;  %s2665_s9 = smov [#allocation13]  }
 0x478   :  { %v1654_v4 = vsel %vm1646_vm4, %v1640_v46, %v1650_v3  ;;  %2286 = vmatpush3.bf16.msra.mxu1 %v2475_v55  ;;  %s1960_s0 = sshll.u32 %s2665_s9, 4  ;;  %s1961_s0 = int_to_ptr.vmem [resolvable:$true] %s1960_s0 }
 0x479   :  { %v1656_v5 = vpack.c.bf16 %v1654_v4, %v1652_v61  ;;  %v1655_v7 = vsel %vm1647_vm5, %v1642_v2, %v1651_v34  ;;  %s2596_s18 = scalar_lea.vmem %s1961_s0, 256  ;;  %p2601_p2 = scmp.lt.s32.totalorder %s1961_s0, %s1961_s0 }
 0x47a   :  { %v1657_v8 = vpack.c.bf16 %v1655_v7, %v1653_v6  ;;  %p2597_p1 = scmp.ne.s32.totalorder %s1961_s0, %s2596_s18  ;;  %p2602_p3 = scmp.lt.s32.totalorder %s2596_s18, %s2596_s18 }
 0x47c   :  { %1825 = vmatprep.mubr.bf16.mxu0 %v1657_v8  ;;  %p2603_p4 = por %p2602_p3, %p2601_p2 }
 0x47d   :  { %1826 = vmatmul.mubr.bf16.vlgmr.msra.gmra.mrb[12].mxu0 %v1656_v5 }
 0x47e   :  { %p2604_p5 = pnand %p2603_p4, %p2597_p1 }
 0x550   :  { %v2236_v11 = vpop.f32.mrb[12].mxu0 }
 0x551   :  { %v2237_v12 = vpop.f32.mrb[13].mxu0 }
 0x552   :  { %v2238_v16 = vadd.f32 %v2237_v12, %v2236_v11  ;;  %v2239_v17 = vpop.f32.mrb[14].mxu0 }
 0x553   :  { %v2240_v18 = vpop.f32.mrb[15].mxu0 }
 0x554   :  { %v1828_v24 = vadd.f32 %v2238_v16, %v3170_v19  ;;  %v2241_v26 = vadd.f32 %v2240_v18, %v2239_v17 }
 0x556   :  { %v1836_v28 = vmul.f32 %v1828_v24, %v3172_v30  ;;  %v1831_v31 = vadd.f32 %v2241_v26, %v3170_v19  ;;  %vm1834_vm6 = vcmp.gt.f32.partialorder %v1828_v24, 0.0 }
 0x558   :  { %vm1835_vm7 = vcmp.gt.f32.partialorder %v1831_v31, 0.0  ;;  %v1837_v49 = vmul.f32 %v1831_v31, %v3172_v30  ;;  %v1838_v32 = vsel %vm1834_vm6, %v1828_v24, %v1836_v28 }
 0x55a   :  { %v1839_v36 = vsel %vm1835_vm7, %v1831_v31, %v1837_v49 }
 0x55b   :  { %v1840_v37 = vpack.c.bf16 %v1839_v36, %v1838_v32 }
 0x55d   :  { %2288 = vmatmul.mubr.bf16.vlgmr.msra.gmra.mrb[12].mxu1 %v1840_v37 }
 0x55e   :  { %2607 = shalt.err (!%p2604_p5)
}
 0x55f   :  { %s2608_s20 = scalar_lea.hbm %s3313_s11, 256 }
 0x560   :  { %p2609_p6 = scmp.ne.s32.totalorder %s3313_s11, %s2608_s20  ;;  %p2612_p7 = scmp.lt.u32.totalorder %s2608_s20, %s3313_s11 }
 0x562   :  { %p2614_p8 = pnand %p2612_p7, %p2609_p6 }
 0x564   :  { %2617 = shalt.err (!%p2614_p8)
}
 0x565   :  { %1966 = dma.vmem_to_hbm [thread:$0]  %s1961_s0, 256, %s3313_s11, [#allocation4], %s2654_s15, %s2654_s15, %s2655_s16  }
 0x566   :  { %s2666_s25 = smov [#allocation14]  }
 0x567   :  { %s1972_s26 = sshll.u32 %s2666_s25, 4  ;;  %s1973_s26 = int_to_ptr.vmem [resolvable:$true] %s1972_s26 }
 0x568   :  { %s2618_s7 = scalar_lea.vmem %s1973_s26, 256  ;;  %p2623_p10 = scmp.lt.s32.totalorder %s1973_s26, %s1973_s26 }
 0x569   :  { %p2619_p9 = scmp.ne.s32.totalorder %s1973_s26, %s2618_s7  ;;  %p2624_p11 = scmp.lt.s32.totalorder %s2618_s7, %s2618_s7 }
 0x56b   :  { %p2625_p12 = por %p2624_p11, %p2623_p10 }
 0x56d   :  { %p2626_p13 = pnand %p2625_p12, %p2619_p9 }
 0x630   :  { %v1946_v19 = vpop.f32.mrb[12].mxu1 }
 0x631   :  { %v1947_v30 = vadd.f32 %v3241_v59, %v1946_v19  ;;  %v2289_v40 = vpop.f32.mrb[13].mxu1 }
 0x632   :  { %v1949_v20 = vpop.f32.mrb[14].mxu1 }
 0x633   :  { %v1950_v43 = vadd.f32 %v3241_v59, %v1949_v20  ;;  %v2290_v45 = vpop.f32.mrb[15].mxu1  ;;  %1953 = vst.msk [vmem:[#allocation14] sm:$0xff] %vm1038_vm1, %v1947_v30 }
 0x635   :  { %1954 = vst.msk [vmem:[#allocation14 + $0x8] sm:$0xff] %vm1038_vm1, %v1950_v43 }
 0x636   :  { %2629 = shalt.err (!%p2626_p13)
}
 0x637   :  { %s2630_s5 = scalar_lea.hbm %s3314_s12, 256 }
 0x638   :  { %p2631_p0 = scmp.ne.s32.totalorder %s3314_s12, %s2630_s5  ;;  %p2634_p1 = scmp.lt.u32.totalorder %s2630_s5, %s3314_s12 }
 0x63a   :  { %p2636_p2 = pnand %p2634_p1, %p2631_p0 }
 0x63c   :  { %2639 = shalt.err (!%p2636_p2)
}
 0x63d   :  { %1978 = dma.vmem_to_hbm [thread:$0]  %s1973_s26, 256, %s3314_s12, [#allocation15], %s2654_s15, %s2654_s15, %s2655_s16  }
 0x63e   :  { %2648 = dma.done.wait [#allocation4], 256  }
 0x63f   :  { %2649 = vsyncadd [#allocation4], 4294967040 }
 0x640   :  { %2650 = dma.done.wait [#allocation15], 256  }
 0x641   :  { %2651 = vsyncadd [#allocation15], 4294967040 }
 0x642   :  { %1985 = vsyncpa [#allocation3], 1 }
 0x643   :  { %1986 = vsyncpa [#allocation8], 1 }
 0x644   :  { %1987 = vsyncpa [#allocation11], 1 }
 0x645   :  { %1988 = vsyncpa [#allocation4], 1 }
 0x646   :  { %1989 = vsyncpa [#allocation15], 1 }
 0x647   :  { %1990 = vsyncpa [#allocation5], 1 }

</bundles_post_ra>
